<compile_context>
chip_gen: v7x
topology: tpu7x:2x2x1
jax: 0.10.0
libtpu: 0.0.40
codegen_flags: <defaults>
</compile_context>

<pallas_src>
import math

import jax
import jax.numpy as jnp
from jax.experimental import pallas as pl
from jax.experimental.pallas import tpu as pltpu

F_IN = 680          # real feature dim
F_PAD = 768         # padded to a multiple of 128 lanes
HID = 512
LAT = 2             # latent dim
ENC_PAD = 128       # encoder output padded from 4 -> 128 lanes


def vae_kernel(x_ref, eps_ref,
               w1_ref, b1_ref, w2_ref, b2_ref,
               w3_ref, b3_ref, w4_ref, b4_ref,
               recon_ref, enc_ref):
    # ---- encoder: Linear(680->512) + ReLU + Linear(512->4, padded to 128) ----
    x = x_ref[...]                                                      # (tb, 768) bf16
    h = jnp.dot(x, w1_ref[...], preferred_element_type=jnp.float32) + b1_ref[...]
    h = jnp.maximum(h, 0.0)                                             # (tb, 512) f32

    enc = jnp.dot(h.astype(jnp.bfloat16), w2_ref[...],
                  preferred_element_type=jnp.float32) + b2_ref[...]     # (tb, 128) f32
    enc_ref[...] = enc                                                  # lane-dense store

    # ---- chunk(2, dim=1): mu = enc[:, :2], log_var = enc[:, 2:4] ----
    mu = enc[:, 0:LAT]
    log_var = enc[:, LAT:2 * LAT]

    # ---- reparameterize: z = mu + eps * exp(0.5 * log_var) ----
    std = jnp.exp(0.5 * log_var)
    z = mu + eps_ref[...] * std                                         # (tb, 2) f32

    # ---- decoder layer 1 (K=2): outer-product sum on the VPU ----
    h2 = (z[:, 0:1] * w3_ref[0:1, :]
          + z[:, 1:2] * w3_ref[1:2, :]
          + b3_ref[...])                                                # (tb, 512) f32
    h2 = jnp.maximum(h2, 0.0)

    # ---- decoder layer 2: Linear(512->680, padded to 768) + Sigmoid ----
    logits = jnp.dot(h2.astype(jnp.bfloat16), w4_ref[...],
                     preferred_element_type=jnp.float32) + b4_ref[...]  # (tb, 768) f32
    # sigmoid(x) = 0.5*tanh(0.5*x)+0.5 : one EUP op, exact (no approx recip)
    recon = 0.5 * jnp.tanh(0.5 * logits) + 0.5
    recon_ref[...] = recon.astype(recon_ref.dtype)


def _round_up(n, m):
    return ((n + m - 1) // m) * m


def _linear_params(key, fan_in, fan_out):
    """torch.nn.Linear-style init (uniform +-1/sqrt(fan_in)); weight as (in, out)."""
    kw, kb = jax.random.split(key)
    bound = 1.0 / math.sqrt(fan_in)
    w = jax.random.uniform(kw, (fan_in, fan_out), jnp.float32, -bound, bound)
    b = jax.random.uniform(kb, (1, fan_out), jnp.float32, -bound, bound)
    return w, b


def prepare_params(params):
    """Pad + cast weights once: bf16 for the MXU-fed matrices, f32 elsewhere."""
    (w1, b1), (w2, b2), (w3, b3), (w4, b4) = params
    w1p = jnp.pad(w1, ((0, F_PAD - F_IN), (0, 0))).astype(jnp.bfloat16)       # (768, 512)
    b1p = b1                                                                   # (1, 512) f32
    w2p = jnp.pad(w2, ((0, 0), (0, ENC_PAD - 2 * LAT))).astype(jnp.bfloat16)   # (512, 128)
    b2p = jnp.pad(b2, ((0, 0), (0, ENC_PAD - 2 * LAT)))                        # (1, 128) f32
    w3p = w3                                                                   # (2, 512) f32 (VPU path)
    b3p = b3                                                                   # (1, 512) f32
    w4p = jnp.pad(w4, ((0, 0), (0, F_PAD - F_IN))).astype(jnp.bfloat16)        # (512, 768)
    b4p = jnp.pad(b4, ((0, 0), (0, F_PAD - F_IN)))                             # (1, 768) f32
    return (w1p, b1p, w2p, b2p, w3p, b3p, w4p, b4p)


def prepare_input(x):
    """Pad feature dim to 768 and cast to bf16 ONCE (hoisted out of the forward).

    Doing this per forward call would be a separate XLA HBM pass over the
    largest tensor; callers should keep x in this padded bf16 layout.
    """
    return jnp.pad(x, ((0, 0), (0, F_PAD - F_IN))).astype(jnp.bfloat16)


def _choose_tile(B, block_b):
    """Pick the batch tile: big tiles to amortize grid-step overhead, but
    guarantee >= 2 grid steps for B >= 256 so both v7x TensorCores are used."""
    if B < 256:
        return _round_up(B, 8)                         # single tile (full batch dim)
    return min(block_b, _round_up(pl.cdiv(B, 2), 128))  # tiles of 128..block_b rows


def vae_forward(x_p, eps, prepared, *, block_b=512, recon_dtype=jnp.float32):
    """x_p: (B, F_PAD) bf16 from prepare_input(); eps: (B, LAT) f32 noise."""
    B = x_p.shape[0]
    w1, b1, w2, b2, w3, b3, w4, b4 = prepared

    tb = _choose_tile(B, block_b)
    Bp = pl.cdiv(B, tb) * tb
    if Bp != B:
        x_p = jnp.pad(x_p, ((0, Bp - B), (0, 0)))
        eps = jnp.pad(eps, ((0, Bp - B), (0, 0)))
    grid = (Bp // tb,)

    row = lambda i: (i, 0)     # batch-tiled arrays
    fix = lambda i: (0, 0)     # weights / biases stay resident in VMEM

    out_shapes = (
        jax.ShapeDtypeStruct((Bp, F_PAD), recon_dtype),    # reconstruction (padded)
        jax.ShapeDtypeStruct((Bp, ENC_PAD), jnp.float32),  # enc = [mu | log_var | 0...]
    )

    recon_p, enc = pl.pallas_call(
        vae_kernel,
        out_shape=out_shapes,
        grid=grid,
        in_specs=[
            pl.BlockSpec((tb, F_PAD), row),      # x (bf16)
            pl.BlockSpec((tb, LAT), row),        # eps (f32)
            pl.BlockSpec((F_PAD, HID), fix),     # w1 (bf16)
            pl.BlockSpec((1, HID), fix),         # b1
            pl.BlockSpec((HID, ENC_PAD), fix),   # w2 (bf16)
            pl.BlockSpec((1, ENC_PAD), fix),     # b2
            pl.BlockSpec((LAT, HID), fix),       # w3 (f32, VPU path)
            pl.BlockSpec((1, HID), fix),         # b3
            pl.BlockSpec((HID, F_PAD), fix),     # w4 (bf16)
            pl.BlockSpec((1, F_PAD), fix),       # b4
        ],
        out_specs=(
            pl.BlockSpec((tb, F_PAD), row),
            pl.BlockSpec((tb, ENC_PAD), row),
        ),
        compiler_params=pltpu.CompilerParams(
            dimension_semantics=("parallel",),
        ),
    )(x_p, eps, w1, b1, w2, b2, w3, b3, w4, b4)

    # NOTE: this slice is a separate HBM pass; fuse it into the consumer (loss)
    # when chaining, by taking recon_p directly.
    recon = recon_p[:B, :F_IN]
    mu = enc[:B, 0:LAT]
    log_var = enc[:B, LAT:2 * LAT]
    return recon, mu, log_var


def _reference(x_p, eps, prepared):
    """Pure-JAX reference using the same padded bf16 params/input (sanity check)."""
    w1, b1, w2, b2, w3, b3, w4, b4 = prepared
    h = jnp.maximum(jnp.dot(x_p, w1, preferred_element_type=jnp.float32) + b1, 0.0)
    enc = jnp.dot(h.astype(jnp.bfloat16), w2, preferred_element_type=jnp.float32) + b2
    mu, log_var = enc[:, 0:LAT], enc[:, LAT:2 * LAT]
    z = mu + eps * jnp.exp(0.5 * log_var)
    h2 = jnp.maximum(jnp.dot(z, w3) + b3, 0.0)
    logits = jnp.dot(h2.astype(jnp.bfloat16), w4, preferred_element_type=jnp.float32) + b4
    return jax.nn.sigmoid(logits)[:, :F_IN], mu, log_var


if __name__ == "__main__":
    key = jax.random.PRNGKey(0)
    k_x, k_eps, k1, k2, k3, k4 = jax.random.split(key, 6)

    B = 8
    x = jax.random.uniform(k_x, (B, F_IN), jnp.float32)    # model input
    eps = jax.random.normal(k_eps, (B, LAT), jnp.float32)  # reparameterization noise
    # TODO(synk): eps is an explicit input (matches torch.randn_like semantics);
    # could be generated in-kernel with pltpu.prng_seed / prng_random_bits.

    params = (
        _linear_params(k1, F_IN, HID),     # encoder[0]: Linear(680, 512)
        _linear_params(k2, HID, 2 * LAT),  # encoder[2]: Linear(512, 4)
        _linear_params(k3, LAT, HID),      # decoder[0]: Linear(2, 512)
        _linear_params(k4, HID, F_IN),     # decoder[2]: Linear(512, 680)
    )
    prepared = prepare_params(params)
    x_p = prepare_input(x)                 # pad + bf16 cast, done once upstream

    recon, mu, log_var = vae_forward(x_p, eps, prepared)
    jax.block_until_ready((recon, mu, log_var))

    assert recon.shape == (B, F_IN) and mu.shape == (B, LAT) and log_var.shape == (B, LAT)

    # Sanity check against a pure-JAX reference using the same bf16 params.
    r_ref, mu_ref, lv_ref = _reference(x_p, eps, prepared)
    assert jnp.max(jnp.abs(recon - r_ref)) < 5e-2
    assert jnp.max(jnp.abs(mu - mu_ref)) < 5e-2
    assert jnp.max(jnp.abs(log_var - lv_ref)) < 5e-2

    print("KERNEL_OK")
</pallas_src>

<mosaic_0001>
module attributes {stable_mosaic.version = 11 : i64} {
  func.func @vae_kernel(%arg0: i32, %arg1: memref<8x768xbf16, #tpu.memory_space<vmem>>, %arg2: memref<8x2xf32, #tpu.memory_space<vmem>>, %arg3: memref<768x512xbf16, #tpu.memory_space<vmem>>, %arg4: memref<1x512xf32, #tpu.memory_space<vmem>>, %arg5: memref<512x128xbf16, #tpu.memory_space<vmem>>, %arg6: memref<1x128xf32, #tpu.memory_space<vmem>>, %arg7: memref<2x512xf32, #tpu.memory_space<vmem>>, %arg8: memref<1x512xf32, #tpu.memory_space<vmem>>, %arg9: memref<512x768xbf16, #tpu.memory_space<vmem>>, %arg10: memref<1x768xf32, #tpu.memory_space<vmem>>, %arg11: memref<8x768xf32, #tpu.memory_space<vmem>>, %arg12: memref<8x128xf32, #tpu.memory_space<vmem>>) attributes {dimension_semantics = [#tpu.dimension_semantics<parallel>], iteration_bounds = array<i64: 1>, scalar_prefetch = 0 : i64, scratch_operands = 0 : i64, tpu.core_type = #tpu.core_type<tc>, window_params = [{transform_indices = @transform_0, window_bounds = array<i64: 8, 768>}, {transform_indices = @transform_1, window_bounds = array<i64: 8, 2>}, {pipeline_mode = #tpu.pipeline_mode<synchronous>, transform_indices = @transform_2, window_bounds = array<i64: 768, 512>}, {pipeline_mode = #tpu.pipeline_mode<synchronous>, transform_indices = @transform_3, window_bounds = array<i64: 1, 512>}, {pipeline_mode = #tpu.pipeline_mode<synchronous>, transform_indices = @transform_4, window_bounds = array<i64: 512, 128>}, {pipeline_mode = #tpu.pipeline_mode<synchronous>, transform_indices = @transform_5, window_bounds = array<i64: 1, 128>}, {pipeline_mode = #tpu.pipeline_mode<synchronous>, transform_indices = @transform_6, window_bounds = array<i64: 2, 512>}, {pipeline_mode = #tpu.pipeline_mode<synchronous>, transform_indices = @transform_7, window_bounds = array<i64: 1, 512>}, {pipeline_mode = #tpu.pipeline_mode<synchronous>, transform_indices = @transform_8, window_bounds = array<i64: 512, 768>}, {pipeline_mode = #tpu.pipeline_mode<synchronous>, transform_indices = @transform_9, window_bounds = array<i64: 1, 768>}, {transform_indices = @transform_10, window_bounds = array<i64: 8, 768>}, {transform_indices = @transform_11, window_bounds = array<i64: 8, 128>}]} {
    %c0 = arith.constant 0 : index
    %c0_0 = arith.constant 0 : index
    %0 = vector.load %arg1[%c0, %c0_0] : memref<8x768xbf16, #tpu.memory_space<vmem>>, vector<8x768xbf16>
    %c0_1 = arith.constant 0 : index
    %c0_2 = arith.constant 0 : index
    %1 = vector.load %arg3[%c0_1, %c0_2] : memref<768x512xbf16, #tpu.memory_space<vmem>>, vector<768x512xbf16>
    %cst = arith.constant dense<0.000000e+00> : vector<8x512xf32>
    %2 = tpu.matmul %0, %1, %cst {dimension_numbers = #tpu.dot_dimension_numbers<[1], [0], [0], [1], [0, 0, 1, 1], [], []>} : vector<8x768xbf16>, vector<768x512xbf16>, vector<8x512xf32> -> vector<8x512xf32>
    %c0_3 = arith.constant 0 : index
    %c0_4 = arith.constant 0 : index
    %3 = vector.load %arg4[%c0_3, %c0_4] : memref<1x512xf32, #tpu.memory_space<vmem>>, vector<1x512xf32>
    %4 = vector.broadcast %3 : vector<1x512xf32> to vector<8x512xf32>
    %5 = arith.addf %2, %4 : vector<8x512xf32>
    %cst_5 = arith.constant 0.000000e+00 : f32
    %6 = vector.broadcast %cst_5 : f32 to vector<8x512xf32>
    %7 = arith.maximumf %5, %6 : vector<8x512xf32>
    %8 = arith.truncf %7 : vector<8x512xf32> to vector<8x512xbf16>
    %c0_6 = arith.constant 0 : index
    %c0_7 = arith.constant 0 : index
    %9 = vector.load %arg5[%c0_6, %c0_7] : memref<512x128xbf16, #tpu.memory_space<vmem>>, vector<512x128xbf16>
    %cst_8 = arith.constant dense<0.000000e+00> : vector<8x128xf32>
    %10 = tpu.matmul %8, %9, %cst_8 {dimension_numbers = #tpu.dot_dimension_numbers<[1], [0], [0], [1], [0, 0, 1, 1], [], []>} : vector<8x512xbf16>, vector<512x128xbf16>, vector<8x128xf32> -> vector<8x128xf32>
    %c0_9 = arith.constant 0 : index
    %c0_10 = arith.constant 0 : index
    %11 = vector.load %arg6[%c0_9, %c0_10] : memref<1x128xf32, #tpu.memory_space<vmem>>, vector<1x128xf32>
    %12 = vector.broadcast %11 : vector<1x128xf32> to vector<8x128xf32>
    %13 = arith.addf %10, %12 : vector<8x128xf32>
    %c0_11 = arith.constant 0 : index
    %c0_12 = arith.constant 0 : index
    %14 = vector.load %arg12[%c0_11, %c0_12] : memref<8x128xf32, #tpu.memory_space<vmem>>, vector<8x128xf32>
    tpu.vector_store %arg12[%c0_11, %c0_12], %13 {strides = array<i32>} : memref<8x128xf32, #tpu.memory_space<vmem>>, vector<8x128xf32>,
    %15 = vector.extract_strided_slice %13 {offsets = [0, 0], sizes = [8, 2], strides = [1, 1]} : vector<8x128xf32> to vector<8x2xf32>
    %16 = vector.extract_strided_slice %13 {offsets = [0, 2], sizes = [8, 2], strides = [1, 1]} : vector<8x128xf32> to vector<8x2xf32>
    %cst_13 = arith.constant 5.000000e-01 : f32
    %17 = vector.broadcast %cst_13 : f32 to vector<8x2xf32>
    %18 = arith.mulf %17, %16 : vector<8x2xf32>
    %19 = math.exp %18 : vector<8x2xf32>
    %c0_14 = arith.constant 0 : index
    %c0_15 = arith.constant 0 : index
    %20 = vector.load %arg2[%c0_14, %c0_15] : memref<8x2xf32, #tpu.memory_space<vmem>>, vector<8x2xf32>
    %21 = arith.mulf %20, %19 : vector<8x2xf32>
    %22 = arith.addf %15, %21 : vector<8x2xf32>
    %23 = vector.extract_strided_slice %22 {offsets = [0, 0], sizes = [8, 1], strides = [1, 1]} : vector<8x2xf32> to vector<8x1xf32>
    %c0_16 = arith.constant 0 : index
    %c0_17 = arith.constant 0 : index
    %24 = vector.load %arg7[%c0_16, %c0_17] : memref<2x512xf32, #tpu.memory_space<vmem>>, vector<1x512xf32>
    %25 = vector.broadcast %23 : vector<8x1xf32> to vector<8x512xf32>
    %26 = vector.broadcast %24 : vector<1x512xf32> to vector<8x512xf32>
    %27 = arith.mulf %25, %26 : vector<8x512xf32>
    %28 = vector.extract_strided_slice %22 {offsets = [0, 1], sizes = [8, 1], strides = [1, 1]} : vector<8x2xf32> to vector<8x1xf32>
    %c1 = arith.constant 1 : index
    %c0_18 = arith.constant 0 : index
    %29 = vector.load %arg7[%c1, %c0_18] : memref<2x512xf32, #tpu.memory_space<vmem>>, vector<1x512xf32>
    %30 = vector.broadcast %28 : vector<8x1xf32> to vector<8x512xf32>
    %31 = vector.broadcast %29 : vector<1x512xf32> to vector<8x512xf32>
    %32 = arith.mulf %30, %31 : vector<8x512xf32>
    %33 = arith.addf %27, %32 : vector<8x512xf32>
    %c0_19 = arith.constant 0 : index
    %c0_20 = arith.constant 0 : index
    %34 = vector.load %arg8[%c0_19, %c0_20] : memref<1x512xf32, #tpu.memory_space<vmem>>, vector<1x512xf32>
    %35 = vector.broadcast %34 : vector<1x512xf32> to vector<8x512xf32>
    %36 = arith.addf %33, %35 : vector<8x512xf32>
    %cst_21 = arith.constant 0.000000e+00 : f32
    %37 = vector.broadcast %cst_21 : f32 to vector<8x512xf32>
    %38 = arith.maximumf %36, %37 : vector<8x512xf32>
    %39 = arith.truncf %38 : vector<8x512xf32> to vector<8x512xbf16>
    %c0_22 = arith.constant 0 : index
    %c0_23 = arith.constant 0 : index
    %40 = vector.load %arg9[%c0_22, %c0_23] : memref<512x768xbf16, #tpu.memory_space<vmem>>, vector<512x768xbf16>
    %cst_24 = arith.constant dense<0.000000e+00> : vector<8x768xf32>
    %41 = tpu.matmul %39, %40, %cst_24 {dimension_numbers = #tpu.dot_dimension_numbers<[1], [0], [0], [1], [0, 0, 1, 1], [], []>} : vector<8x512xbf16>, vector<512x768xbf16>, vector<8x768xf32> -> vector<8x768xf32>
    %c0_25 = arith.constant 0 : index
    %c0_26 = arith.constant 0 : index
    %42 = vector.load %arg10[%c0_25, %c0_26] : memref<1x768xf32, #tpu.memory_space<vmem>>, vector<1x768xf32>
    %43 = vector.broadcast %42 : vector<1x768xf32> to vector<8x768xf32>
    %44 = arith.addf %41, %43 : vector<8x768xf32>
    %cst_27 = arith.constant 5.000000e-01 : f32
    %45 = vector.broadcast %cst_27 : f32 to vector<8x768xf32>
    %46 = arith.mulf %45, %44 : vector<8x768xf32>
    %47 = math.tanh %46 : vector<8x768xf32>
    %cst_28 = arith.constant 5.000000e-01 : f32
    %48 = vector.broadcast %cst_28 : f32 to vector<8x768xf32>
    %49 = arith.mulf %48, %47 : vector<8x768xf32>
    %cst_29 = arith.constant 5.000000e-01 : f32
    %50 = vector.broadcast %cst_29 : f32 to vector<8x768xf32>
    %51 = arith.addf %49, %50 : vector<8x768xf32>
    %c0_30 = arith.constant 0 : index
    %c0_31 = arith.constant 0 : index
    %52 = vector.load %arg11[%c0_30, %c0_31] : memref<8x768xf32, #tpu.memory_space<vmem>>, vector<8x768xf32>
    tpu.vector_store %arg11[%c0_30, %c0_31], %51 {strides = array<i32>} : memref<8x768xf32, #tpu.memory_space<vmem>>, vector<8x768xf32>,
    return
  }
  func.func @transform_0(%arg0: i32) -> (i32, i32) {
    %c0_i32 = arith.constant 0 : i32
    %c0_i32_0 = arith.constant 0 : i32
    return %arg0, %c0_i32 : i32, i32
  }
  func.func @transform_1(%arg0: i32) -> (i32, i32) {
    %c0_i32 = arith.constant 0 : i32
    %c0_i32_0 = arith.constant 0 : i32
    return %arg0, %c0_i32 : i32, i32
  }
  func.func @transform_2(%arg0: i32) -> (i32, i32) {
    %c0_i32 = arith.constant 0 : i32
    %c0_i32_0 = arith.constant 0 : i32
    %c0_i32_1 = arith.constant 0 : i32
    return %c0_i32, %c0_i32_0 : i32, i32
  }
  func.func @transform_3(%arg0: i32) -> (i32, i32) {
    %c0_i32 = arith.constant 0 : i32
    %c0_i32_0 = arith.constant 0 : i32
    %c0_i32_1 = arith.constant 0 : i32
    return %c0_i32, %c0_i32_0 : i32, i32
  }
  func.func @transform_4(%arg0: i32) -> (i32, i32) {
    %c0_i32 = arith.constant 0 : i32
    %c0_i32_0 = arith.constant 0 : i32
    %c0_i32_1 = arith.constant 0 : i32
    return %c0_i32, %c0_i32_0 : i32, i32
  }
  func.func @transform_5(%arg0: i32) -> (i32, i32) {
    %c0_i32 = arith.constant 0 : i32
    %c0_i32_0 = arith.constant 0 : i32
    %c0_i32_1 = arith.constant 0 : i32
    return %c0_i32, %c0_i32_0 : i32, i32
  }
  func.func @transform_6(%arg0: i32) -> (i32, i32) {
    %c0_i32 = arith.constant 0 : i32
    %c0_i32_0 = arith.constant 0 : i32
    %c0_i32_1 = arith.constant 0 : i32
    return %c0_i32, %c0_i32_0 : i32, i32
  }
  func.func @transform_7(%arg0: i32) -> (i32, i32) {
    %c0_i32 = arith.constant 0 : i32
    %c0_i32_0 = arith.constant 0 : i32
    %c0_i32_1 = arith.constant 0 : i32
    return %c0_i32, %c0_i32_0 : i32, i32
  }
  func.func @transform_8(%arg0: i32) -> (i32, i32) {
    %c0_i32 = arith.constant 0 : i32
    %c0_i32_0 = arith.constant 0 : i32
    %c0_i32_1 = arith.constant 0 : i32
    return %c0_i32, %c0_i32_0 : i32, i32
  }
  func.func @transform_9(%arg0: i32) -> (i32, i32) {
    %c0_i32 = arith.constant 0 : i32
    %c0_i32_0 = arith.constant 0 : i32
    %c0_i32_1 = arith.constant 0 : i32
    return %c0_i32, %c0_i32_0 : i32, i32
  }
  func.func @transform_10(%arg0: i32) -> (i32, i32) {
    %c0_i32 = arith.constant 0 : i32
    %c0_i32_0 = arith.constant 0 : i32
    return %arg0, %c0_i32 : i32, i32
  }
  func.func @transform_11(%arg0: i32) -> (i32, i32) {
    %c0_i32 = arith.constant 0 : i32
    %c0_i32_0 = arith.constant 0 : i32
    return %arg0, %c0_i32 : i32, i32
  }
}

</mosaic_0001>

<bundles_post_ra>
// kernel: tpu_custom_call.1
= control target key start
LH: loop header
LB: loop body
LE: loop exit
PB: predicated region body
PF: predicated region fallthrough
CT: control target
= control target key end

     0   :  { %17 = vsyncpa [#allocation3], 0  ;;  %s5046_s0 = inlined_call_operand.hbm [shape: bf16[8,768], index: 0, kind: input, shape index: {}]   ;;  %s5047_s1 = inlined_call_operand.vmem [shape: f32[8,2], index: 1, kind: input, shape index: {}]   ;;  %s5048_s2 = inlined_call_operand.hbm [shape: bf16[768,512], index: 2, kind: input, shape index: {}]   ;;  %s5049_s3 = inlined_call_operand.vmem [shape: f32[1,512], index: 3, kind: input, shape index: {}]   ;;  %s5050_s4 = inlined_call_operand.hbm [shape: bf16[512,128], index: 4, kind: input, shape index: {}]   ;;  %s5051_s5 = inlined_call_operand.vmem [shape: f32[1,128], index: 5, kind: input, shape index: {}]   ;;  %s5052_s6 = inlined_call_operand.vmem [shape: f32[2,512], index: 6, kind: input, shape index: {}]   ;;  %s5053_s7 = inlined_call_operand.vmem [shape: f32[1,512], index: 7, kind: input, shape index: {}]   ;;  %s5054_s8 = inlined_call_operand.hbm [shape: bf16[512,768], index: 8, kind: input, shape index: {}]   ;;  %s5055_s9 = inlined_call_operand.vmem [shape: f32[1,768], index: 9, kind: input, shape index: {}]   ;;  %s5056_s10 = inlined_call_operand.hbm [shape: f32[8,768], index: 10, kind: output, shape index: {0}]   ;;  %s5057_s11 = inlined_call_operand.hbm [shape: f32[8,128], index: 11, kind: output, shape index: {1}]  }
   0x1   :  { %18 = vsyncpa [#allocation6], 0 }
   0x2   :  { %19 = vsyncpa [#allocation9], 0 }
   0x3   :  { %20 = vsyncpa [#allocation4], 0 }
   0x4   :  { %21 = vsyncpa [#allocation12], 0  ;;  %s4782_s17 = smov [#allocation5]   ;;  %s4640_s21 = scalar_lea.hbm %s5048_s2, 24576 }
   0x5   :  { %s39_s18 = sshll.u32 %s4782_s17, 4  ;;  %p4641_p0 = scmp.ne.s32.totalorder %s5048_s2, %s4640_s21  ;;  %s40_s18 = int_to_ptr.vmem [resolvable:$true] %s39_s18 }
   0x6   :  { %p4644_p1 = scmp.lt.u32.totalorder %s4640_s21, %s5048_s2 }
   0x8   :  { %p4646_p2 = pnand %p4644_p1, %p4641_p0 }
   0xa   :  { %4649 = shalt.err (!%p4646_p2)
}
   0xb   :  { %s4650_s26 = scalar_lea.vmem %s40_s18, 24576  ;;  %p4655_p4 = scmp.lt.s32.totalorder %s40_s18, %s40_s18 }
   0xc   :  { %p4651_p3 = scmp.ne.s32.totalorder %s40_s18, %s4650_s26  ;;  %p4656_p5 = scmp.lt.s32.totalorder %s4650_s26, %s4650_s26 }
   0xe   :  { %p4657_p6 = por %p4656_p5, %p4655_p4 }
  0x10   :  { %p4658_p7 = pnand %p4657_p6, %p4651_p3 }
  0x12   :  { %4661 = shalt.err (!%p4658_p7)
}
  0x13   :  { %s4783_s27 = smov 256   ;;  %s4784_s28 = smov 16  }
  0x14   :  { %45 = dma.hbm_to_vmem [thread:$0]  %s5048_s2, 24576, %s40_s18, [#allocation6], %s4783_s27, %s4783_s27, %s4784_s28  }
  0x15   :  { %s4785_s12 = smov [#allocation2]   ;;  %s4786_s14 = smov [#allocation7]  }
  0x16   :  { %s28_s13 = sshll.u32 %s4785_s12, 4  ;;  %s53_s15 = sshll.u32 %s4786_s14, 4  ;;  %s29_s13 = int_to_ptr.vmem [resolvable:$true] %s28_s13  ;;  %s54_s15 = int_to_ptr.vmem [resolvable:$true] %s53_s15 }
  0x17   :  { %s4662_s19 = scalar_lea.hbm %s5046_s0, 384 }
  0x18   :  { %p4663_p8 = scmp.ne.s32.totalorder %s5046_s0, %s4662_s19  ;;  %p4666_p9 = scmp.lt.u32.totalorder %s4662_s19, %s5046_s0 }
  0x1a   :  { %p4668_p10 = pnand %p4666_p9, %p4663_p8 }
  0x1c   :  { %4671 = shalt.err (!%p4668_p10)
}
  0x1d   :  { %s4672_s2 = scalar_lea.vmem %s29_s13, 384  ;;  %p4677_p12 = scmp.lt.s32.totalorder %s29_s13, %s29_s13 }
  0x1e   :  { %p4673_p11 = scmp.ne.s32.totalorder %s29_s13, %s4672_s2  ;;  %p4678_p13 = scmp.lt.s32.totalorder %s4672_s2, %s4672_s2 }
  0x20   :  { %p4679_p0 = por %p4678_p13, %p4677_p12 }
  0x22   :  { %p4680_p1 = pnand %p4679_p0, %p4673_p11 }
  0x24   :  { %4683 = shalt.err (!%p4680_p1)
}
  0x25   :  { %31 = dma.hbm_to_vmem [thread:$0]  %s5046_s0, 384, %s29_s13, [#allocation3]  }
  0x26   :  { %s4684_s27 = scalar_lea.hbm %s5050_s4, 4096 }
  0x27   :  { %p4685_p2 = scmp.ne.s32.totalorder %s5050_s4, %s4684_s27  ;;  %p4688_p3 = scmp.lt.u32.totalorder %s4684_s27, %s5050_s4 }
  0x29   :  { %p4690_p4 = pnand %p4688_p3, %p4685_p2 }
  0x2b   :  { %4693 = shalt.err (!%p4690_p4)
}
  0x2c   :  { %s4694_s14 = scalar_lea.vmem %s54_s15, 4096  ;;  %p4699_p6 = scmp.lt.s32.totalorder %s54_s15, %s54_s15 }
  0x2d   :  { %p4695_p5 = scmp.ne.s32.totalorder %s54_s15, %s4694_s14  ;;  %p4700_p7 = scmp.lt.s32.totalorder %s4694_s14, %s4694_s14 }
  0x2f   :  { %p4701_p8 = por %p4700_p7, %p4699_p6 }
  0x31   :  { %p4702_p9 = pnand %p4701_p8, %p4695_p5 }
  0x33   :  { %4705 = shalt.err (!%p4702_p9)
}
  0x34   :  { %s4787_s0 = smov 64   ;;  %s4788_s13 = smov 4  }
  0x35   :  { %59 = dma.hbm_to_vmem [thread:$0]  %s5050_s4, 4096, %s54_s15, [#allocation6], %s4787_s0, %s4787_s0, %s4788_s13  }
  0x36   :  { %s4789_s19 = smov [#allocation8]   ;;  %s4706_s23 = scalar_lea.hbm %s5054_s8, 24576 }
  0x37   :  { %s71_s20 = sshll.u32 %s4789_s19, 4  ;;  %p4707_p10 = scmp.ne.s32.totalorder %s5054_s8, %s4706_s23  ;;  %s72_s20 = int_to_ptr.vmem [resolvable:$true] %s71_s20 }
  0x38   :  { %p4710_p11 = scmp.lt.u32.totalorder %s4706_s23, %s5054_s8 }
  0x3a   :  { %p4712_p12 = pnand %p4710_p11, %p4707_p10 }
  0x3c   :  { %4715 = shalt.err (!%p4712_p12)
}
  0x3d   :  { %s4716_s26 = scalar_lea.vmem %s72_s20, 24576  ;;  %p4721_p0 = scmp.lt.s32.totalorder %s72_s20, %s72_s20 }
  0x3e   :  { %p4717_p13 = scmp.ne.s32.totalorder %s72_s20, %s4716_s26  ;;  %p4722_p1 = scmp.lt.s32.totalorder %s4716_s26, %s4716_s26 }
  0x40   :  { %p4723_p2 = por %p4722_p1, %p4721_p0 }
  0x42   :  { %p4724_p3 = pnand %p4723_p2, %p4717_p13 }
  0x44   :  { %4727 = shalt.err (!%p4724_p3)
}
  0x45   :  { %s4790_s4 = smov 384   ;;  %s4791_s15 = smov 24  }
  0x46   :  { %77 = dma.hbm_to_vmem [thread:$0]  %s5054_s8, 24576, %s72_s20, [#allocation9], %s4790_s4, %s4790_s4, %s4791_s15  }
  0x47   :  { %4772 = dma.done.wait [#allocation3], 384  }
  0x48   :  { %4773 = vsyncadd [#allocation3], 4294966912 }
  0x49   :  { %4774 = dma.done.wait [#allocation6], 28672  }
  0x4a   :  { %4775 = vsyncadd [#allocation6], 4294938624 }
  0x4b   :  { %4776 = dma.done.wait [#allocation9], 24576  }
  0x4c   :  { %4777 = vsyncadd [#allocation9], 4294942720  ;;  %v4012_v0 = vld [vmem:[#allocation5 + $0x4] ss:$16 sps:$4 sm:$0xff]   ;;  %v4016_v2 = vld [vmem:[#allocation5] ss:$16 sps:$4 sm:$0xff]  }
  0x4d   :  { %v4014_v1 = vld [vmem:[#allocation5 + $0x204] ss:$16 sps:$4 sm:$0xff]   ;;  %1291 = vmatprep.subr.bf16.mxu1 %v4012_v0  ;;  %v4017_v3 = vld [vmem:[#allocation5 + $0x200] ss:$16 sps:$4 sm:$0xff]   ;;  %v93_v46 = vld [vmem:[#allocation2] sm:$0xff] }
  0x4e   :  { %1332 = vmatprep.subr.bf16.mxu0 %v4014_v1  ;;  %v4018_v4 = vld [vmem:[#allocation5 + $0x24] ss:$16 sps:$4 sm:$0xff]   ;;  %1292 = vmatpush1.bf16.msra.mxu1 %v4016_v2  ;;  %v4022_v6 = vld [vmem:[#allocation5 + $0x20] ss:$16 sps:$4 sm:$0xff]   ;;  %v4905_v47 = vcombine.high %v93_v46, %v93_v46 }
  0x4f   :  { %1333 = vmatpush1.bf16.msra.mxu0 %v4017_v3  ;;  %v4020_v5 = vld [vmem:[#allocation5 + $0x224] ss:$16 sps:$4 sm:$0xff]   ;;  %1293 = vmatprep.subr.bf16.mxu1 %v4018_v4  ;;  %v4023_v7 = vld [vmem:[#allocation5 + $0x220] ss:$16 sps:$4 sm:$0xff]  }
  0x50   :  { %1334 = vmatprep.subr.bf16.mxu0 %v4020_v5  ;;  %v4024_v8 = vld [vmem:[#allocation5 + $0x44] ss:$16 sps:$4 sm:$0xff]   ;;  %v4028_v10 = vld [vmem:[#allocation5 + $0x40] ss:$16 sps:$4 sm:$0xff]   ;;  %1323 = vmatprep.mubr.bf16.mxu1 %v4905_v47  ;;  %v4117_v5 = vld [vmem:[#allocation5 + $0xc] ss:$16 sps:$4 sm:$0xff]  }
  0x51   :  { %v4026_v9 = vld [vmem:[#allocation5 + $0x244] ss:$16 sps:$4 sm:$0xff]   ;;  %v4029_v11 = vld [vmem:[#allocation5 + $0x240] ss:$16 sps:$4 sm:$0xff]  }
  0x52   :  { %1294 = vmatpush1.bf16.msra.mxu1 %v4022_v6  ;;  %v4030_v12 = vld [vmem:[#allocation5 + $0x64] ss:$16 sps:$4 sm:$0xff]   ;;  %v4034_v14 = vld [vmem:[#allocation5 + $0x60] ss:$16 sps:$4 sm:$0xff]   ;;  %v4911_v6 = vcombine.low %v93_v46, %v93_v46 }
  0x53   :  { %1335 = vmatpush1.bf16.msra.mxu0 %v4023_v7  ;;  %1295 = vmatprep.subr.bf16.mxu1 %v4024_v8  ;;  %v4032_v13 = vld [vmem:[#allocation5 + $0x264] ss:$16 sps:$4 sm:$0xff]   ;;  %v4035_v15 = vld [vmem:[#allocation5 + $0x260] ss:$16 sps:$4 sm:$0xff]  }
  0x54   :  { %1336 = vmatprep.subr.bf16.mxu0 %v4026_v9  ;;  %v4036_v16 = vld [vmem:[#allocation5 + $0x84] ss:$16 sps:$4 sm:$0xff]   ;;  %v4040_v18 = vld [vmem:[#allocation5 + $0x80] ss:$16 sps:$4 sm:$0xff]   ;;  %v4115_v9 = vld [vmem:[#allocation5 + $0x8] ss:$16 sps:$4 sm:$0xff]  }
  0x55   :  { %v4038_v17 = vld [vmem:[#allocation5 + $0x284] ss:$16 sps:$4 sm:$0xff]   ;;  %v4041_v19 = vld [vmem:[#allocation5 + $0x280] ss:$16 sps:$4 sm:$0xff]  }
  0x56   :  { %1296 = vmatpush1.bf16.msra.mxu1 %v4028_v10  ;;  %v4042_v20 = vld [vmem:[#allocation5 + $0xa4] ss:$16 sps:$4 sm:$0xff]   ;;  %v4046_v22 = vld [vmem:[#allocation5 + $0xa0] ss:$16 sps:$4 sm:$0xff]  }
  0x57   :  { %1337 = vmatpush1.bf16.msra.mxu0 %v4029_v11  ;;  %1297 = vmatprep.subr.bf16.mxu1 %v4030_v12  ;;  %v4044_v21 = vld [vmem:[#allocation5 + $0x2a4] ss:$16 sps:$4 sm:$0xff]   ;;  %v4047_v23 = vld [vmem:[#allocation5 + $0x2a0] ss:$16 sps:$4 sm:$0xff]   ;;  %v4123_v11 = vld [vmem:[#allocation5 + $0x2c] ss:$16 sps:$4 sm:$0xff]  }
  0x58   :  { %1338 = vmatprep.subr.bf16.mxu0 %v4032_v13  ;;  %v4048_v24 = vld [vmem:[#allocation5 + $0xc4] ss:$16 sps:$4 sm:$0xff]   ;;  %v4052_v26 = vld [vmem:[#allocation5 + $0xc0] ss:$16 sps:$4 sm:$0xff]   ;;  %v4121_v13 = vld [vmem:[#allocation5 + $0x28] ss:$16 sps:$4 sm:$0xff]  }
  0x59   :  { %v4050_v25 = vld [vmem:[#allocation5 + $0x2c4] ss:$16 sps:$4 sm:$0xff]   ;;  %v4053_v27 = vld [vmem:[#allocation5 + $0x2c0] ss:$16 sps:$4 sm:$0xff]  }
  0x5a   :  { %1298 = vmatpush1.bf16.msra.mxu1 %v4034_v14  ;;  %v4054_v28 = vld [vmem:[#allocation5 + $0xe4] ss:$16 sps:$4 sm:$0xff]   ;;  %v4058_v30 = vld [vmem:[#allocation5 + $0xe0] ss:$16 sps:$4 sm:$0xff]  }
  0x5b   :  { %1339 = vmatpush1.bf16.msra.mxu0 %v4035_v15  ;;  %1299 = vmatprep.subr.bf16.mxu1 %v4036_v16  ;;  %v4056_v29 = vld [vmem:[#allocation5 + $0x2e4] ss:$16 sps:$4 sm:$0xff]   ;;  %v4059_v31 = vld [vmem:[#allocation5 + $0x2e0] ss:$16 sps:$4 sm:$0xff]   ;;  %v4129_v15 = vld [vmem:[#allocation5 + $0x4c] ss:$16 sps:$4 sm:$0xff]  }
  0x5c   :  { %1340 = vmatprep.subr.bf16.mxu0 %v4038_v17  ;;  %v4060_v32 = vld [vmem:[#allocation5 + $0x104] ss:$16 sps:$4 sm:$0xff]   ;;  %v4064_v34 = vld [vmem:[#allocation5 + $0x100] ss:$16 sps:$4 sm:$0xff]   ;;  %v4127_v17 = vld [vmem:[#allocation5 + $0x48] ss:$16 sps:$4 sm:$0xff]  }
  0x5d   :  { %v4062_v33 = vld [vmem:[#allocation5 + $0x304] ss:$16 sps:$4 sm:$0xff]   ;;  %v4065_v35 = vld [vmem:[#allocation5 + $0x300] ss:$16 sps:$4 sm:$0xff]  }
  0x5e   :  { %1300 = vmatpush1.bf16.msra.mxu1 %v4040_v18  ;;  %v4066_v36 = vld [vmem:[#allocation5 + $0x124] ss:$16 sps:$4 sm:$0xff]   ;;  %v4070_v38 = vld [vmem:[#allocation5 + $0x120] ss:$16 sps:$4 sm:$0xff]  }
  0x5f   :  { %1341 = vmatpush1.bf16.msra.mxu0 %v4041_v19  ;;  %1301 = vmatprep.subr.bf16.mxu1 %v4042_v20  ;;  %v4068_v37 = vld [vmem:[#allocation5 + $0x324] ss:$16 sps:$4 sm:$0xff]   ;;  %v4071_v39 = vld [vmem:[#allocation5 + $0x320] ss:$16 sps:$4 sm:$0xff]   ;;  %v4135_v19 = vld [vmem:[#allocation5 + $0x6c] ss:$16 sps:$4 sm:$0xff]  }
  0x60   :  { %1342 = vmatprep.subr.bf16.mxu0 %v4044_v21  ;;  %v4072_v40 = vld [vmem:[#allocation5 + $0x144] ss:$16 sps:$4 sm:$0xff]   ;;  %v4076_v42 = vld [vmem:[#allocation5 + $0x140] ss:$16 sps:$4 sm:$0xff]   ;;  %v4133_v21 = vld [vmem:[#allocation5 + $0x68] ss:$16 sps:$4 sm:$0xff]  }
  0x61   :  { %v4074_v41 = vld [vmem:[#allocation5 + $0x344] ss:$16 sps:$4 sm:$0xff]   ;;  %v4077_v43 = vld [vmem:[#allocation5 + $0x340] ss:$16 sps:$4 sm:$0xff]  }
  0x62   :  { %1302 = vmatpush1.bf16.msra.mxu1 %v4046_v22  ;;  %v4078_v44 = vld [vmem:[#allocation5 + $0x164] ss:$16 sps:$4 sm:$0xff]   ;;  %v4082_v49 = vld [vmem:[#allocation5 + $0x160] ss:$16 sps:$4 sm:$0xff]  }
  0x63   :  { %1343 = vmatpush1.bf16.msra.mxu0 %v4047_v23  ;;  %1303 = vmatprep.subr.bf16.mxu1 %v4048_v24  ;;  %v4080_v45 = vld [vmem:[#allocation5 + $0x364] ss:$16 sps:$4 sm:$0xff]   ;;  %v4083_v50 = vld [vmem:[#allocation5 + $0x360] ss:$16 sps:$4 sm:$0xff]   ;;  %v4141_v23 = vld [vmem:[#allocation5 + $0x8c] ss:$16 sps:$4 sm:$0xff]  }
  0x64   :  { %1344 = vmatprep.subr.bf16.mxu0 %v4050_v25  ;;  %v94_v48 = vld [vmem:[#allocation2 + $0x8] sm:$0xff]  ;;  %v4139_v25 = vld [vmem:[#allocation5 + $0x88] ss:$16 sps:$4 sm:$0xff]  }
  0x65   :  { %v4907_v51 = vcombine.high %v94_v48, %v94_v48  ;;  %v4084_v52 = vld [vmem:[#allocation5 + $0x184] ss:$16 sps:$4 sm:$0xff]   ;;  %v4088_v54 = vld [vmem:[#allocation5 + $0x180] ss:$16 sps:$4 sm:$0xff]   ;;  %v4913_v7 = vcombine.low %v94_v48, %v94_v48 }
  0x66   :  { %1304 = vmatpush1.bf16.msra.mxu1 %v4052_v26  ;;  %v4086_v53 = vld [vmem:[#allocation5 + $0x384] ss:$16 sps:$4 sm:$0xff]   ;;  %v4089_v55 = vld [vmem:[#allocation5 + $0x380] ss:$16 sps:$4 sm:$0xff]  }
  0x67   :  { %1345 = vmatpush1.bf16.msra.mxu0 %v4053_v27  ;;  %1305 = vmatprep.subr.bf16.mxu1 %v4054_v28  ;;  %v4090_v56 = vld [vmem:[#allocation5 + $0x1a4] ss:$16 sps:$4 sm:$0xff]   ;;  %v4094_v58 = vld [vmem:[#allocation5 + $0x1a0] ss:$16 sps:$4 sm:$0xff]   ;;  %v4147_v27 = vld [vmem:[#allocation5 + $0xac] ss:$16 sps:$4 sm:$0xff]  }
  0x68   :  { %1346 = vmatprep.subr.bf16.mxu0 %v4056_v29  ;;  %1364 = vmatprep.mubr.bf16.mxu0 %v4907_v51  ;;  %v4092_v57 = vld [vmem:[#allocation5 + $0x3a4] ss:$16 sps:$4 sm:$0xff]   ;;  %v4095_v59 = vld [vmem:[#allocation5 + $0x3a0] ss:$16 sps:$4 sm:$0xff]   ;;  %v4145_v29 = vld [vmem:[#allocation5 + $0xa8] ss:$16 sps:$4 sm:$0xff]  }
  0x69   :  { %v4096_v60 = vld [vmem:[#allocation5 + $0x1c4] ss:$16 sps:$4 sm:$0xff]   ;;  %v4100_v62 = vld [vmem:[#allocation5 + $0x1c0] ss:$16 sps:$4 sm:$0xff]  }
  0x6a   :  { %1306 = vmatpush1.bf16.msra.mxu1 %v4058_v30  ;;  %v4098_v61 = vld [vmem:[#allocation5 + $0x3c4] ss:$16 sps:$4 sm:$0xff]   ;;  %v4101_v63 = vld [vmem:[#allocation5 + $0x3c0] ss:$16 sps:$4 sm:$0xff]  }
  0x6b   :  { %1347 = vmatpush1.bf16.msra.mxu0 %v4059_v31  ;;  %1307 = vmatprep.subr.bf16.mxu1 %v4060_v32  ;;  %v4102_v0 = vld [vmem:[#allocation5 + $0x1e4] ss:$16 sps:$4 sm:$0xff]   ;;  %v4106_v2 = vld [vmem:[#allocation5 + $0x1e0] ss:$16 sps:$4 sm:$0xff]   ;;  %v4153_v31 = vld [vmem:[#allocation5 + $0xcc] ss:$16 sps:$4 sm:$0xff]  }
  0x6c   :  { %1348 = vmatprep.subr.bf16.mxu0 %v4062_v33  ;;  %v4104_v1 = vld [vmem:[#allocation5 + $0x3e4] ss:$16 sps:$4 sm:$0xff]   ;;  %v4107_v3 = vld [vmem:[#allocation5 + $0x3e0] ss:$16 sps:$4 sm:$0xff]   ;;  %v4918_v32 = vld [vmem:[#allocation2 + $0x10] sm:$0xff] }
  0x6d   :  { %v4114_v4 = vld [vmem:[#allocation5 + $0x404] ss:$16 sps:$4 sm:$0xff]   ;;  %v4112_v8 = vld [vmem:[#allocation5 + $0x400] ss:$16 sps:$4 sm:$0xff]  }
  0x6e   :  { %1308 = vmatpush1.bf16.msra.mxu1 %v4064_v34  ;;  %v4120_v10 = vld [vmem:[#allocation5 + $0x424] ss:$16 sps:$4 sm:$0xff]   ;;  %v4118_v12 = vld [vmem:[#allocation5 + $0x420] ss:$16 sps:$4 sm:$0xff]   ;;  %v4922_v34 = vcombine.high %v4918_v32, %v4918_v32 }
  0x6f   :  { %1349 = vmatpush1.bf16.msra.mxu0 %v4065_v35  ;;  %1309 = vmatprep.subr.bf16.mxu1 %v4066_v36  ;;  %v4126_v14 = vld [vmem:[#allocation5 + $0x444] ss:$16 sps:$4 sm:$0xff]   ;;  %v4124_v16 = vld [vmem:[#allocation5 + $0x440] ss:$16 sps:$4 sm:$0xff]   ;;  %v4151_v35 = vld [vmem:[#allocation5 + $0xc8] ss:$16 sps:$4 sm:$0xff]  }
  0x70   :  { %1350 = vmatprep.subr.bf16.mxu0 %v4068_v37  ;;  %v4132_v18 = vld [vmem:[#allocation5 + $0x464] ss:$16 sps:$4 sm:$0xff]   ;;  %v4130_v20 = vld [vmem:[#allocation5 + $0x460] ss:$16 sps:$4 sm:$0xff]   ;;  %v4159_v37 = vld [vmem:[#allocation5 + $0xec] ss:$16 sps:$4 sm:$0xff]  }
  0x71   :  { %v4138_v22 = vld [vmem:[#allocation5 + $0x484] ss:$16 sps:$4 sm:$0xff]   ;;  %v4136_v24 = vld [vmem:[#allocation5 + $0x480] ss:$16 sps:$4 sm:$0xff]  }
  0x72   :  { %1310 = vmatpush1.bf16.msra.mxu1 %v4070_v38  ;;  %v4144_v26 = vld [vmem:[#allocation5 + $0x4a4] ss:$16 sps:$4 sm:$0xff]   ;;  %v4142_v28 = vld [vmem:[#allocation5 + $0x4a0] ss:$16 sps:$4 sm:$0xff]  }
  0x73   :  { %1351 = vmatpush1.bf16.msra.mxu0 %v4071_v39  ;;  %1311 = vmatprep.subr.bf16.mxu1 %v4072_v40  ;;  %v4150_v30 = vld [vmem:[#allocation5 + $0x4c4] ss:$16 sps:$4 sm:$0xff]   ;;  %v4148_v33 = vld [vmem:[#allocation5 + $0x4c0] ss:$16 sps:$4 sm:$0xff]   ;;  %v4157_v39 = vld [vmem:[#allocation5 + $0xe8] ss:$16 sps:$4 sm:$0xff]  }
  0x74   :  { %1352 = vmatprep.subr.bf16.mxu0 %v4074_v41  ;;  %v4156_v36 = vld [vmem:[#allocation5 + $0x4e4] ss:$16 sps:$4 sm:$0xff]   ;;  %v4154_v38 = vld [vmem:[#allocation5 + $0x4e0] ss:$16 sps:$4 sm:$0xff]   ;;  %v4165_v41 = vld [vmem:[#allocation5 + $0x10c] ss:$16 sps:$4 sm:$0xff]  }
  0x75   :  { %v4162_v40 = vld [vmem:[#allocation5 + $0x504] ss:$16 sps:$4 sm:$0xff]   ;;  %v4166_v46 = vld [vmem:[#allocation5 + $0x520] ss:$16 sps:$4 sm:$0xff]  }
  0x76   :  { %1312 = vmatpush1.bf16.msra.mxu1 %v4076_v42  ;;  %v4160_v42 = vld [vmem:[#allocation5 + $0x500] ss:$16 sps:$4 sm:$0xff]   ;;  %v4174_v48 = vld [vmem:[#allocation5 + $0x544] ss:$16 sps:$4 sm:$0xff]  }
  0x77   :  { %1353 = vmatpush1.bf16.msra.mxu0 %v4077_v43  ;;  %1313 = vmatprep.subr.bf16.mxu1 %v4078_v44  ;;  %v4163_v43 = vld [vmem:[#allocation5 + $0x108] ss:$16 sps:$4 sm:$0xff]   ;;  %v4168_v44 = vld [vmem:[#allocation5 + $0x524] ss:$16 sps:$4 sm:$0xff]  }
  0x78   :  { %1354 = vmatprep.subr.bf16.mxu0 %v4080_v45  ;;  %v4171_v45 = vld [vmem:[#allocation5 + $0x12c] ss:$16 sps:$4 sm:$0xff]  }
  0x7a   :  { %1314 = vmatpush1.bf16.msra.mxu1 %v4082_v49  ;;  %v4177_v49 = vld [vmem:[#allocation5 + $0x14c] ss:$16 sps:$4 sm:$0xff]  }
  0x7b   :  { %1355 = vmatpush1.bf16.msra.mxu0 %v4083_v50  ;;  %1315 = vmatprep.subr.bf16.mxu1 %v4084_v52  ;;  %v4172_v50 = vld [vmem:[#allocation5 + $0x540] ss:$16 sps:$4 sm:$0xff]   ;;  %v4175_v52 = vld [vmem:[#allocation5 + $0x148] ss:$16 sps:$4 sm:$0xff]  }
  0x7c   :  { %1356 = vmatprep.subr.bf16.mxu0 %v4086_v53  ;;  %v4180_v53 = vld [vmem:[#allocation5 + $0x564] ss:$16 sps:$4 sm:$0xff]  }
  0x7e   :  { %1316 = vmatpush1.bf16.msra.mxu1 %v4088_v54  ;;  %v4183_v54 = vld [vmem:[#allocation5 + $0x16c] ss:$16 sps:$4 sm:$0xff]  }
  0x7f   :  { %1357 = vmatpush1.bf16.msra.mxu0 %v4089_v55  ;;  %1317 = vmatprep.subr.bf16.mxu1 %v4090_v56  ;;  %v4178_v55 = vld [vmem:[#allocation5 + $0x560] ss:$16 sps:$4 sm:$0xff]   ;;  %v4181_v56 = vld [vmem:[#allocation5 + $0x168] ss:$16 sps:$4 sm:$0xff]  }
  0x80   :  { %1358 = vmatprep.subr.bf16.mxu0 %v4092_v57  ;;  %v4186_v57 = vld [vmem:[#allocation5 + $0x584] ss:$16 sps:$4 sm:$0xff]  }
  0x82   :  { %1318 = vmatpush1.bf16.msra.mxu1 %v4094_v58  ;;  %v4189_v58 = vld [vmem:[#allocation5 + $0x18c] ss:$16 sps:$4 sm:$0xff]  }
  0x83   :  { %1359 = vmatpush1.bf16.msra.mxu0 %v4095_v59  ;;  %1319 = vmatprep.subr.bf16.mxu1 %v4096_v60  ;;  %v4184_v59 = vld [vmem:[#allocation5 + $0x580] ss:$16 sps:$4 sm:$0xff]   ;;  %v4187_v60 = vld [vmem:[#allocation5 + $0x188] ss:$16 sps:$4 sm:$0xff]  }
  0x84   :  { %1360 = vmatprep.subr.bf16.mxu0 %v4098_v61  ;;  %v4192_v61 = vld [vmem:[#allocation5 + $0x5a4] ss:$16 sps:$4 sm:$0xff]  }
  0x86   :  { %1320 = vmatpush1.bf16.msra.mxu1 %v4100_v62  ;;  %v4195_v62 = vld [vmem:[#allocation5 + $0x1ac] ss:$16 sps:$4 sm:$0xff]  }
  0x87   :  { %1361 = vmatpush1.bf16.msra.mxu0 %v4101_v63  ;;  %1321 = vmatprep.subr.bf16.mxu1 %v4102_v0  ;;  %v4190_v63 = vld [vmem:[#allocation5 + $0x5a0] ss:$16 sps:$4 sm:$0xff]   ;;  %v4193_v0 = vld [vmem:[#allocation5 + $0x1a8] ss:$16 sps:$4 sm:$0xff]  }
  0x88   :  { %1362 = vmatprep.subr.bf16.mxu0 %v4104_v1  ;;  %v4198_v1 = vld [vmem:[#allocation5 + $0x5c4] ss:$16 sps:$4 sm:$0xff]  }
  0x8a   :  { %1322 = vmatpush1.bf16.msra.mxu1 %v4106_v2  ;;  %v4201_v2 = vld [vmem:[#allocation5 + $0x1cc] ss:$16 sps:$4 sm:$0xff]  }
  0x8b   :  { %1363 = vmatpush1.bf16.msra.mxu0 %v4107_v3  ;;  %1414 = vmatprep.subr.bf16.mxu1 %v4117_v5  ;;  %v4196_v3 = vld [vmem:[#allocation5 + $0x5c0] ss:$16 sps:$4 sm:$0xff]   ;;  %v4204_v5 = vld [vmem:[#allocation5 + $0x5e4] ss:$16 sps:$4 sm:$0xff]  }
  0x8c   :  { %1373 = vmatprep.subr.bf16.mxu0 %v4114_v4  ;;  %v4199_v4 = vld [vmem:[#allocation5 + $0x1c8] ss:$16 sps:$4 sm:$0xff]  }
  0x8d   :  { %1324 = vmatmul.mubr.bf16.vlgmr.msra.gmra.mrb[0].mxu1 %v4911_v6 }
  0x8e   :  { %1365 = vmatmul.mubr.bf16.vlgmr.msra.gmra.mrb[0].mxu0 %v4913_v7  ;;  %1415 = vmatpush1.bf16.msra.mxu1 %v4115_v9  ;;  %v4202_v9 = vld [vmem:[#allocation5 + $0x5e0] ss:$16 sps:$4 sm:$0xff]  }
  0x8f   :  { %1374 = vmatpush1.bf16.msra.mxu0 %v4112_v8  ;;  %1416 = vmatprep.subr.bf16.mxu1 %v4123_v11  ;;  %v4207_v8 = vld [vmem:[#allocation5 + $0x1ec] ss:$16 sps:$4 sm:$0xff]  }
  0x90   :  { %1375 = vmatprep.subr.bf16.mxu0 %v4120_v10  ;;  %1446 = vmatprep.mubr.bf16.mxu1 %v4905_v47  ;;  %v4169_v47 = vld [vmem:[#allocation5 + $0x128] ss:$16 sps:$4 sm:$0xff]   ;;  %v4212_v11 = vld [vmem:[#allocation5 + $0x20c] ss:$16 sps:$4 sm:$0xff]  }
  0x91   :  { %1405 = vmatprep.mubr.bf16.mxu0 %v4922_v34  ;;  %v4205_v10 = vld [vmem:[#allocation5 + $0x1e8] ss:$16 sps:$4 sm:$0xff]  }
  0x92   :  { %1417 = vmatpush1.bf16.msra.mxu1 %v4121_v13  ;;  %v4210_v13 = vld [vmem:[#allocation5 + $0x208] ss:$16 sps:$4 sm:$0xff]  }
  0x93   :  { %1376 = vmatpush1.bf16.msra.mxu0 %v4118_v12  ;;  %1418 = vmatprep.subr.bf16.mxu1 %v4129_v15  ;;  %v4927_v12 = vcombine.low %v4918_v32, %v4918_v32  ;;  %v4213_v15 = vld [vmem:[#allocation5 + $0x228] ss:$16 sps:$4 sm:$0xff]  }
  0x94   :  { %1377 = vmatprep.subr.bf16.mxu0 %v4126_v14  ;;  %v4215_v14 = vld [vmem:[#allocation5 + $0x22c] ss:$16 sps:$4 sm:$0xff]   ;;  %v4234_v32 = vld [vmem:[#allocation5 + $0x308] ss:$16 sps:$4 sm:$0xff]  }
  0x96   :  { %1419 = vmatpush1.bf16.msra.mxu1 %v4127_v17  ;;  %v4216_v17 = vld [vmem:[#allocation5 + $0x248] ss:$16 sps:$4 sm:$0xff]  }
  0x97   :  { %1378 = vmatpush1.bf16.msra.mxu0 %v4124_v16  ;;  %1420 = vmatprep.subr.bf16.mxu1 %v4135_v19  ;;  %v4218_v16 = vld [vmem:[#allocation5 + $0x24c] ss:$16 sps:$4 sm:$0xff]   ;;  %v4219_v19 = vld [vmem:[#allocation5 + $0x268] ss:$16 sps:$4 sm:$0xff]  }
  0x98   :  { %1379 = vmatprep.subr.bf16.mxu0 %v4132_v18  ;;  %v4221_v18 = vld [vmem:[#allocation5 + $0x26c] ss:$16 sps:$4 sm:$0xff]  }
  0x9a   :  { %1421 = vmatpush1.bf16.msra.mxu1 %v4133_v21  ;;  %v4222_v21 = vld [vmem:[#allocation5 + $0x288] ss:$16 sps:$4 sm:$0xff]  }
  0x9b   :  { %1380 = vmatpush1.bf16.msra.mxu0 %v4130_v20  ;;  %1422 = vmatprep.subr.bf16.mxu1 %v4141_v23  ;;  %v4224_v20 = vld [vmem:[#allocation5 + $0x28c] ss:$16 sps:$4 sm:$0xff]   ;;  %v4225_v23 = vld [vmem:[#allocation5 + $0x2a8] ss:$16 sps:$4 sm:$0xff]  }
  0x9c   :  { %1381 = vmatprep.subr.bf16.mxu0 %v4138_v22  ;;  %v4227_v22 = vld [vmem:[#allocation5 + $0x2ac] ss:$16 sps:$4 sm:$0xff]  }
  0x9e   :  { %1423 = vmatpush1.bf16.msra.mxu1 %v4139_v25  ;;  %v4233_v25 = vld [vmem:[#allocation5 + $0x2ec] ss:$16 sps:$4 sm:$0xff]  }
  0x9f   :  { %1382 = vmatpush1.bf16.msra.mxu0 %v4136_v24  ;;  %1424 = vmatprep.subr.bf16.mxu1 %v4147_v27  ;;  %v4230_v24 = vld [vmem:[#allocation5 + $0x2cc] ss:$16 sps:$4 sm:$0xff]  }
  0xa0   :  { %1383 = vmatprep.subr.bf16.mxu0 %v4144_v26  ;;  %v4307_v26 = vld [vmem:[#allocation7] sm:$0xff]   ;;  %v4308_v27 = vld [vmem:[#allocation7 + $0x48] sm:$0xff]  }
  0xa2   :  { %1425 = vmatpush1.bf16.msra.mxu1 %v4145_v29  ;;  %v4236_v29 = vld [vmem:[#allocation5 + $0x30c] ss:$16 sps:$4 sm:$0xff]  }
  0xa3   :  { %1384 = vmatpush1.bf16.msra.mxu0 %v4142_v28  ;;  %1426 = vmatprep.subr.bf16.mxu1 %v4153_v31  ;;  %v4231_v28 = vld [vmem:[#allocation5 + $0x2e8] ss:$16 sps:$4 sm:$0xff]   ;;  %v4310_v31 = vld [vmem:[#allocation7 + $0x50] sm:$0xff]  }
  0xa4   :  { %1385 = vmatprep.subr.bf16.mxu0 %v4150_v30  ;;  %v4309_v30 = vld [vmem:[#allocation7 + $0x8] sm:$0xff]  }
  0xa6   :  { %1427 = vmatpush1.bf16.msra.mxu1 %v4151_v35  ;;  %v4239_v35 = vld [vmem:[#allocation5 + $0x32c] ss:$16 sps:$4 sm:$0xff]  }
  0xa7   :  { %1386 = vmatpush1.bf16.msra.mxu0 %v4148_v33  ;;  %1428 = vmatprep.subr.bf16.mxu1 %v4159_v37  ;;  %v4311_v33 = vld [vmem:[#allocation7 + $0x10] sm:$0xff]   ;;  %v4237_v37 = vld [vmem:[#allocation5 + $0x328] ss:$16 sps:$4 sm:$0xff]  }
  0xa8   :  { %1387 = vmatprep.subr.bf16.mxu0 %v4156_v36  ;;  %v4312_v36 = vld [vmem:[#allocation7 + $0x58] sm:$0xff]  }
  0xaa   :  { %1429 = vmatpush1.bf16.msra.mxu1 %v4157_v39  ;;  %v4242_v39 = vld [vmem:[#allocation5 + $0x34c] ss:$16 sps:$4 sm:$0xff]  }
  0xab   :  { %1388 = vmatpush1.bf16.msra.mxu0 %v4154_v38  ;;  %1430 = vmatprep.subr.bf16.mxu1 %v4165_v41  ;;  %v4313_v38 = vld [vmem:[#allocation7 + $0x18] sm:$0xff]  }
  0xac   :  { %1389 = vmatprep.subr.bf16.mxu0 %v4162_v40  ;;  %v4314_v40 = vld [vmem:[#allocation7 + $0x60] sm:$0xff]   ;;  %v4240_v41 = vld [vmem:[#allocation5 + $0x348] ss:$16 sps:$4 sm:$0xff]  }
  0xae   :  { %1431 = vmatpush1.bf16.msra.mxu1 %v4163_v43  ;;  %v4245_v43 = vld [vmem:[#allocation5 + $0x36c] ss:$16 sps:$4 sm:$0xff]  }
  0xaf   :  { %1390 = vmatpush1.bf16.msra.mxu0 %v4160_v42  ;;  %1432 = vmatprep.subr.bf16.mxu1 %v4171_v45  ;;  %v4315_v42 = vld [vmem:[#allocation7 + $0x20] sm:$0xff]   ;;  %v4243_v45 = vld [vmem:[#allocation5 + $0x368] ss:$16 sps:$4 sm:$0xff]  }
  0xb0   :  { %1391 = vmatprep.subr.bf16.mxu0 %v4168_v44  ;;  %v4316_v44 = vld [vmem:[#allocation7 + $0x68] sm:$0xff]  }
  0xb2   :  { %1433 = vmatpush1.bf16.msra.mxu1 %v4169_v47  ;;  %v4248_v47 = vld [vmem:[#allocation5 + $0x38c] ss:$16 sps:$4 sm:$0xff]  }
  0xb3   :  { %1392 = vmatpush1.bf16.msra.mxu0 %v4166_v46  ;;  %1434 = vmatprep.subr.bf16.mxu1 %v4177_v49  ;;  %v4317_v46 = vld [vmem:[#allocation7 + $0x28] sm:$0xff]  }
  0xb4   :  { %1393 = vmatprep.subr.bf16.mxu0 %v4174_v48  ;;  %v4246_v48 = vld [vmem:[#allocation5 + $0x388] ss:$16 sps:$4 sm:$0xff]   ;;  %v4251_v49 = vld [vmem:[#allocation5 + $0x3ac] ss:$16 sps:$4 sm:$0xff]  }
  0xb6   :  { %1435 = vmatpush1.bf16.msra.mxu1 %v4175_v52  ;;  %v4254_v52 = vld [vmem:[#allocation5 + $0x3cc] ss:$16 sps:$4 sm:$0xff]  }
  0xb7   :  { %1394 = vmatpush1.bf16.msra.mxu0 %v4172_v50  ;;  %1436 = vmatprep.subr.bf16.mxu1 %v4183_v54  ;;  %v4249_v50 = vld [vmem:[#allocation5 + $0x3a8] ss:$16 sps:$4 sm:$0xff]   ;;  %v4257_v54 = vld [vmem:[#allocation5 + $0x3ec] ss:$16 sps:$4 sm:$0xff]  }
  0xb8   :  { %1395 = vmatprep.subr.bf16.mxu0 %v4180_v53  ;;  %v4252_v53 = vld [vmem:[#allocation5 + $0x3c8] ss:$16 sps:$4 sm:$0xff]  }
  0xba   :  { %1437 = vmatpush1.bf16.msra.mxu1 %v4181_v56  ;;  %v4260_v56 = vld [vmem:[#allocation5 + $0x40c] ss:$16 sps:$4 sm:$0xff]  }
  0xbb   :  { %1396 = vmatpush1.bf16.msra.mxu0 %v4178_v55  ;;  %1438 = vmatprep.subr.bf16.mxu1 %v4189_v58  ;;  %v4255_v55 = vld [vmem:[#allocation5 + $0x3e8] ss:$16 sps:$4 sm:$0xff]   ;;  %v4263_v58 = vld [vmem:[#allocation5 + $0x42c] ss:$16 sps:$4 sm:$0xff]  }
  0xbc   :  { %1397 = vmatprep.subr.bf16.mxu0 %v4186_v57  ;;  %v4258_v57 = vld [vmem:[#allocation5 + $0x408] ss:$16 sps:$4 sm:$0xff]  }
  0xbe   :  { %1439 = vmatpush1.bf16.msra.mxu1 %v4187_v60  ;;  %v4266_v60 = vld [vmem:[#allocation5 + $0x44c] ss:$16 sps:$4 sm:$0xff]  }
  0xbf   :  { %1398 = vmatpush1.bf16.msra.mxu0 %v4184_v59  ;;  %1440 = vmatprep.subr.bf16.mxu1 %v4195_v62  ;;  %v4261_v59 = vld [vmem:[#allocation5 + $0x428] ss:$16 sps:$4 sm:$0xff]   ;;  %v4269_v62 = vld [vmem:[#allocation5 + $0x46c] ss:$16 sps:$4 sm:$0xff]  }
  0xc0   :  { %1399 = vmatprep.subr.bf16.mxu0 %v4192_v61  ;;  %v4264_v61 = vld [vmem:[#allocation5 + $0x448] ss:$16 sps:$4 sm:$0xff]  }
  0xc2   :  { %1441 = vmatpush1.bf16.msra.mxu1 %v4193_v0  ;;  %v4272_v0 = vld [vmem:[#allocation5 + $0x48c] ss:$16 sps:$4 sm:$0xff]  }
  0xc3   :  { %1400 = vmatpush1.bf16.msra.mxu0 %v4190_v63  ;;  %1442 = vmatprep.subr.bf16.mxu1 %v4201_v2  ;;  %v4267_v63 = vld [vmem:[#allocation5 + $0x468] ss:$16 sps:$4 sm:$0xff]   ;;  %v4275_v2 = vld [vmem:[#allocation5 + $0x4ac] ss:$16 sps:$4 sm:$0xff]  }
  0xc4   :  { %1401 = vmatprep.subr.bf16.mxu0 %v4198_v1  ;;  %v4270_v1 = vld [vmem:[#allocation5 + $0x488] ss:$16 sps:$4 sm:$0xff]  }
  0xc6   :  { %1443 = vmatpush1.bf16.msra.mxu1 %v4199_v4  ;;  %v4278_v4 = vld [vmem:[#allocation5 + $0x4cc] ss:$16 sps:$4 sm:$0xff]  }
  0xc7   :  { %1402 = vmatpush1.bf16.msra.mxu0 %v4196_v3  ;;  %1444 = vmatprep.subr.bf16.mxu1 %v4207_v8  ;;  %v4273_v3 = vld [vmem:[#allocation5 + $0x4a8] ss:$16 sps:$4 sm:$0xff]   ;;  %v4281_v8 = vld [vmem:[#allocation5 + $0x4ec] ss:$16 sps:$4 sm:$0xff]  }
  0xc8   :  { %1403 = vmatprep.subr.bf16.mxu0 %v4204_v5  ;;  %v4276_v5 = vld [vmem:[#allocation5 + $0x4c8] ss:$16 sps:$4 sm:$0xff]  }
  0xca   :  { %1445 = vmatpush1.bf16.msra.mxu1 %v4205_v10  ;;  %v4321_v10 = vld [vmem:[#allocation7 + $0x38] sm:$0xff]  }
  0xcb   :  { %1404 = vmatpush1.bf16.msra.mxu0 %v4202_v9  ;;  %1455 = vmatprep.subr.bf16.mxu1 %v4212_v11  ;;  %v4320_v9 = vld [vmem:[#allocation7 + $0x78] sm:$0xff]  }
  0xcc   :  { %v4279_v11 = vld [vmem:[#allocation5 + $0x4e8] ss:$16 sps:$4 sm:$0xff]  }
  0xcd   :  { %1447 = vmatmul.mubr.bf16.vlgmr.msra.gmra.mrb[4].mxu1 %v4911_v6  ;;  %v4228_v6 = vld [vmem:[#allocation5 + $0x2c8] ss:$16 sps:$4 sm:$0xff]  }
  0xce   :  { %1406 = vmatmul.mubr.bf16.vlgmr.msra.gmra.mrb[0].mxu0 %v4927_v12  ;;  %1456 = vmatpush1.bf16.msra.mxu1 %v4210_v13  ;;  %v4284_v13 = vld [vmem:[#allocation5 + $0x50c] ss:$16 sps:$4 sm:$0xff]  }
  0xcf   :  { %1487 = vmatprep.mubr.bf16.mxu1 %v4907_v51  ;;  %1457 = vmatprep.subr.bf16.mxu1 %v4215_v14  ;;  %v4306_v51 = vld [vmem:[#allocation7 + $0x40] sm:$0xff]   ;;  %v4282_v14 = vld [vmem:[#allocation5 + $0x508] ss:$16 sps:$4 sm:$0xff]  }
  0xd0   :  { %3914 = vmatprep.subr.bf16.mxu0 %v4306_v51  ;;  %v4305_v51 = vld [vmem:[#allocation5 + $0x5ec] ss:$16 sps:$4 sm:$0xff]  }
  0xd1   :  { %3915 = vmatpush3.bf16.msra.mxu0 %v4307_v26  ;;  %v4303_v26 = vld [vmem:[#allocation5 + $0x5e8] ss:$16 sps:$4 sm:$0xff]  }
  0xd2   :  { %1458 = vmatpush1.bf16.msra.mxu1 %v4213_v15  ;;  %3916 = vmatprep.subr.bf16.mxu0 %v4308_v27  ;;  %v4287_v15 = vld [vmem:[#allocation5 + $0x52c] ss:$16 sps:$4 sm:$0xff]   ;;  %v4322_v27 = vld [vmem:[#allocation7 + $0xc0] sm:$0xff]  }
  0xd3   :  { %1459 = vmatprep.subr.bf16.mxu1 %v4218_v16  ;;  %v4285_v16 = vld [vmem:[#allocation5 + $0x528] ss:$16 sps:$4 sm:$0xff]  }
  0xd5   :  { %3917 = vmatpush3.bf16.msra.mxu0 %v4309_v30  ;;  %v4325_v30 = vld [vmem:[#allocation7 + $0x88] sm:$0xff]  }
  0xd6   :  { %1460 = vmatpush1.bf16.msra.mxu1 %v4216_v17  ;;  %3918 = vmatprep.subr.bf16.mxu0 %v4310_v31  ;;  %v4290_v17 = vld [vmem:[#allocation5 + $0x54c] ss:$16 sps:$4 sm:$0xff]   ;;  %v4326_v31 = vld [vmem:[#allocation7 + $0xd0] sm:$0xff]  }
  0xd7   :  { %1461 = vmatprep.subr.bf16.mxu1 %v4221_v18  ;;  %v4288_v18 = vld [vmem:[#allocation5 + $0x548] ss:$16 sps:$4 sm:$0xff]  }
  0xd9   :  { %3919 = vmatpush3.bf16.msra.mxu0 %v4311_v33  ;;  %v4328_v33 = vld [vmem:[#allocation7 + $0xd8] sm:$0xff]  }
  0xda   :  { %1462 = vmatpush1.bf16.msra.mxu1 %v4219_v19  ;;  %3920 = vmatprep.subr.bf16.mxu0 %v4312_v36  ;;  %v4293_v19 = vld [vmem:[#allocation5 + $0x56c] ss:$16 sps:$4 sm:$0xff]   ;;  %v4330_v36 = vld [vmem:[#allocation7 + $0xe0] sm:$0xff]  }
  0xdb   :  { %1463 = vmatprep.subr.bf16.mxu1 %v4224_v20  ;;  %v4291_v20 = vld [vmem:[#allocation5 + $0x568] ss:$16 sps:$4 sm:$0xff]  }
  0xdd   :  { %3921 = vmatpush3.bf16.msra.mxu0 %v4313_v38  ;;  %v4332_v38 = vld [vmem:[#allocation7 + $0xe8] sm:$0xff]  }
  0xde   :  { %1464 = vmatpush1.bf16.msra.mxu1 %v4222_v21  ;;  %3922 = vmatprep.subr.bf16.mxu0 %v4314_v40  ;;  %v4296_v21 = vld [vmem:[#allocation5 + $0x58c] ss:$16 sps:$4 sm:$0xff]  }
  0xdf   :  { %1465 = vmatprep.subr.bf16.mxu1 %v4227_v22  ;;  %v4294_v22 = vld [vmem:[#allocation5 + $0x588] ss:$16 sps:$4 sm:$0xff]  }
  0xe1   :  { %3923 = vmatpush3.bf16.msra.mxu0 %v4315_v42 }
  0xe2   :  { %1466 = vmatpush1.bf16.msra.mxu1 %v4225_v23  ;;  %3924 = vmatprep.subr.bf16.mxu0 %v4316_v44  ;;  %v4299_v23 = vld [vmem:[#allocation5 + $0x5ac] ss:$16 sps:$4 sm:$0xff]  }
  0xe3   :  { %1467 = vmatprep.subr.bf16.mxu1 %v4230_v24  ;;  %v4297_v24 = vld [vmem:[#allocation5 + $0x5a8] ss:$16 sps:$4 sm:$0xff]  }
  0xe5   :  { %3925 = vmatpush3.bf16.msra.mxu0 %v4317_v46  ;;  %v288_v46 = vld [vmem:[%s5049_s3] sm:$0xf] }
  0xe6   :  { %1468 = vmatpush1.bf16.msra.mxu1 %v4228_v6  ;;  %v4302_v6 = vld [vmem:[#allocation5 + $0x5cc] ss:$16 sps:$4 sm:$0xff]  }
  0xe7   :  { %1469 = vmatprep.subr.bf16.mxu1 %v4233_v25  ;;  %v4300_v25 = vld [vmem:[#allocation5 + $0x5c8] ss:$16 sps:$4 sm:$0xff]  }
  0xea   :  { %1470 = vmatpush1.bf16.msra.mxu1 %v4231_v28  ;;  %v4323_v28 = vld [vmem:[#allocation7 + $0x80] sm:$0xff]  }
  0xeb   :  { %1471 = vmatprep.subr.bf16.mxu1 %v4236_v29  ;;  %v4324_v29 = vld [vmem:[#allocation7 + $0xc8] sm:$0xff]  }
  0xee   :  { %1472 = vmatpush1.bf16.msra.mxu1 %v4234_v32  ;;  %v4327_v32 = vld [vmem:[#allocation7 + $0x90] sm:$0xff]  }
  0xef   :  { %1473 = vmatprep.subr.bf16.mxu1 %v4239_v35  ;;  %v4329_v35 = vld [vmem:[#allocation7 + $0x98] sm:$0xff]  }
  0xf2   :  { %1474 = vmatpush1.bf16.msra.mxu1 %v4237_v37  ;;  %v4331_v37 = vld [vmem:[#allocation7 + $0xa0] sm:$0xff]  }
  0xf3   :  { %1475 = vmatprep.subr.bf16.mxu1 %v4242_v39  ;;  %v4333_v39 = vld [vmem:[#allocation7 + $0xa8] sm:$0xff]  }
  0xf6   :  { %1476 = vmatpush1.bf16.msra.mxu1 %v4240_v41 }
  0xf7   :  { %1477 = vmatprep.subr.bf16.mxu1 %v4245_v43  ;;  %v290_v43 = vlaneseq }
  0xf9   :  { %v4935_v44 = vshrl.u32 %v290_v43, 7  ;;  %v4350_v43 = vld [vmem:[#allocation8 + $0x60] ss:$24 sps:$4 sm:$0xff]  }
  0xfa   :  { %1478 = vmatpush1.bf16.msra.mxu1 %v4243_v45 }
  0xfb   :  { %1479 = vmatprep.subr.bf16.mxu1 %v4248_v47  ;;  %v4938_v45 = vsub.s32 0, %v4935_v44  ;;  %v4944_v47 = vsub.s32 1, %v4935_v44 }
  0xfe   :  { %1480 = vmatpush1.bf16.msra.mxu1 %v4246_v48  ;;  %v293_v48 = vrot.slane %v288_v46, %v4938_v45 }
  0xff   :  { %1481 = vmatprep.subr.bf16.mxu1 %v4251_v49  ;;  %v297_v49 = vrot.slane %v288_v46, %v4944_v47 }
 0x102   :  { %1482 = vmatpush1.bf16.msra.mxu1 %v4249_v50 }
 0x103   :  { %1483 = vmatprep.subr.bf16.mxu1 %v4254_v52  ;;  %v4334_v52 = vld [vmem:[#allocation7 + $0xf0] sm:$0xff]  }
 0x106   :  { %1484 = vmatpush1.bf16.msra.mxu1 %v4252_v53 }
 0x107   :  { %1485 = vmatprep.subr.bf16.mxu1 %v4257_v54 }
 0x10a   :  { %1486 = vmatpush1.bf16.msra.mxu1 %v4255_v55  ;;  %v4335_v55 = vld [vmem:[#allocation7 + $0xb0] sm:$0xff]  }
 0x10b   :  { %1496 = vmatprep.subr.bf16.mxu1 %v4260_v56 }
 0x10d   :  { %1488 = vmatmul.mubr.bf16.vlgmr.msra.gmra.mrb[4].mxu1 %v4913_v7  ;;  %v4318_v7 = vld [vmem:[#allocation7 + $0x70] sm:$0xff]  }
 0x10e   :  { %1497 = vmatpush1.bf16.msra.mxu1 %v4258_v57  ;;  %1528 = vmatprep.mubr.bf16.mxu1 %v4922_v34  ;;  %v4319_v34 = vld [vmem:[#allocation7 + $0x30] sm:$0xff]  }
 0x10f   :  { %1498 = vmatprep.subr.bf16.mxu1 %v4263_v58  ;;  %3926 = vmatprep.subr.bf16.mxu0 %v4318_v7 }
 0x110   :  { %3927 = vmatpush3.bf16.msra.mxu0 %v4319_v34 }
 0x111   :  { %3928 = vmatprep.subr.bf16.mxu0 %v4320_v9 }
 0x112   :  { %1499 = vmatpush1.bf16.msra.mxu1 %v4261_v59 }
 0x113   :  { %1500 = vmatprep.subr.bf16.mxu1 %v4266_v60 }
 0x114   :  { %3929 = vmatpush3.bf16.msra.mxu0 %v4321_v10 }
 0x116   :  { %1501 = vmatpush1.bf16.msra.mxu1 %v4264_v61 }
 0x117   :  { %1502 = vmatprep.subr.bf16.mxu1 %v4269_v62  ;;  %v4336_v62 = vld [vmem:[#allocation7 + $0xf8] sm:$0xff]  }
 0x11a   :  { %1503 = vmatpush1.bf16.msra.mxu1 %v4267_v63 }
 0x11b   :  { %1504 = vmatprep.subr.bf16.mxu1 %v4272_v0  ;;  %v4337_v0 = vld [vmem:[#allocation7 + $0xb8] sm:$0xff]  }
 0x11e   :  { %1505 = vmatpush1.bf16.msra.mxu1 %v4270_v1 }
 0x11f   :  { %1506 = vmatprep.subr.bf16.mxu1 %v4275_v2 }
 0x122   :  { %1507 = vmatpush1.bf16.msra.mxu1 %v4273_v3  ;;  %v4949_v3 = vsub.s32 2, %v4935_v44 }
 0x123   :  { %1508 = vmatprep.subr.bf16.mxu1 %v4278_v4  ;;  %v4952_v4 = vsub.s32 3, %v4935_v44 }
 0x124   :  { %v301_v7 = vrot.slane %v288_v46, %v4949_v3 }
 0x126   :  { %1509 = vmatpush1.bf16.msra.mxu1 %v4276_v5  ;;  %v305_v5 = vrot.slane %v288_v46, %v4952_v4 }
 0x127   :  { %1510 = vmatprep.subr.bf16.mxu1 %v4281_v8 }
 0x12a   :  { %1511 = vmatpush1.bf16.msra.mxu1 %v4279_v11 }
 0x12b   :  { %1512 = vmatprep.subr.bf16.mxu1 %v4284_v13 }
 0x12e   :  { %1513 = vmatpush1.bf16.msra.mxu1 %v4282_v14 }
 0x12f   :  { %1514 = vmatprep.subr.bf16.mxu1 %v4287_v15 }
 0x132   :  { %1515 = vmatpush1.bf16.msra.mxu1 %v4285_v16 }
 0x133   :  { %1516 = vmatprep.subr.bf16.mxu1 %v4290_v17 }
 0x136   :  { %1517 = vmatpush1.bf16.msra.mxu1 %v4288_v18 }
 0x137   :  { %1518 = vmatprep.subr.bf16.mxu1 %v4293_v19 }
 0x13a   :  { %1519 = vmatpush1.bf16.msra.mxu1 %v4291_v20 }
 0x13b   :  { %1520 = vmatprep.subr.bf16.mxu1 %v4296_v21 }
 0x13e   :  { %1521 = vmatpush1.bf16.msra.mxu1 %v4294_v22 }
 0x13f   :  { %1522 = vmatprep.subr.bf16.mxu1 %v4299_v23  ;;  %v3688_v23 = vld [vmem:[%s5051_s5] ss:$0 sm:$0xff]  ;;  %s4794_s5 = smov 126  }
 0x142   :  { %1523 = vmatpush1.bf16.msra.mxu1 %v4297_v24 }
 0x143   :  { %1524 = vmatprep.subr.bf16.mxu1 %v4302_v6 }
 0x146   :  { %1525 = vmatpush1.bf16.msra.mxu1 %v4300_v25 }
 0x147   :  { %1526 = vmatprep.subr.bf16.mxu1 %v4305_v51 }
 0x14a   :  { %1527 = vmatpush1.bf16.msra.mxu1 %v4303_v26 }
 0x14b   :  { %3936 = vmatprep.subr.bf16.mxu1 %v4322_v27 }
 0x14d   :  { %1529 = vmatmul.mubr.bf16.vlgmr.msra.gmra.mrb[4].mxu1 %v4927_v12 }
 0x14e   :  { %3937 = vmatpush3.bf16.msra.mxu1 %v4323_v28 }
 0x14f   :  { %3938 = vmatprep.subr.bf16.mxu1 %v4324_v29 }
 0x152   :  { %3939 = vmatpush3.bf16.msra.mxu1 %v4325_v30 }
 0x153   :  { %3940 = vmatprep.subr.bf16.mxu1 %v4326_v31  ;;  %v4792_v31 = vmov 1  }
 0x154   :  { %4010 = vset.pattern.permute.xlu1 %v4792_v31 }
 0x156   :  { %3941 = vmatpush3.bf16.msra.mxu1 %v4327_v32  ;;  %v4793_v32 = vmov 0  }
 0x157   :  { %3942 = vmatprep.subr.bf16.mxu1 %v4328_v33  ;;  %4009 = vset.pattern.permute.xlu0 %v4793_v32  ;;  %v4338_v33 = vld [vmem:[#allocation8] ss:$24 sps:$4 sm:$0xff]  }
 0x158   :  { %v4419_v32 = vld [vmem:[#allocation8 + $0x278] ss:$24 sps:$4 sm:$0xff]  }
 0x15a   :  { %3943 = vmatpush3.bf16.msra.mxu1 %v4329_v35  ;;  %v4340_v35 = vld [vmem:[#allocation8 + $0x4] ss:$24 sps:$4 sm:$0xff]  }
 0x15b   :  { %3944 = vmatprep.subr.bf16.mxu1 %v4330_v36  ;;  %v4341_v36 = vld [vmem:[#allocation8 + $0x8] ss:$24 sps:$4 sm:$0xff]   ;;  %3183 = vmatprep.subr.bf16.mxu0 %v4340_v35 }
 0x15e   :  { %3945 = vmatpush3.bf16.msra.mxu1 %v4331_v37  ;;  %v4343_v37 = vld [vmem:[#allocation8 + $0xc] ss:$24 sps:$4 sm:$0xff]  }
 0x15f   :  { %3946 = vmatprep.subr.bf16.mxu1 %v4332_v38  ;;  %v4346_v38 = vld [vmem:[#allocation8 + $0x34] ss:$24 sps:$4 sm:$0xff]  }
 0x160   :  { %v1325_v12 = vpop.f32.mrb[0].mxu1 }
 0x161   :  { %v1327_v40 = vpop.f32.mrb[1].mxu1  ;;  %v1326_v50 = vadd.f32 %v1325_v12, %v293_v48  ;;  %v4344_v12 = vld [vmem:[#allocation8 + $0x30] ss:$24 sps:$4 sm:$0xff]  }
 0x162   :  { %v1329_v41 = vpop.f32.mrb[2].mxu1  ;;  %3947 = vmatpush3.bf16.msra.mxu1 %v4333_v39  ;;  %v1328_v53 = vadd.f32 %v1327_v40, %v297_v49  ;;  %v4349_v39 = vld [vmem:[#allocation8 + $0x3c] ss:$24 sps:$4 sm:$0xff]   ;;  %v4347_v40 = vld [vmem:[#allocation8 + $0x38] ss:$24 sps:$4 sm:$0xff]  }
 0x163   :  { %v1330_v42 = vpop.f32.mrb[3].mxu1  ;;  %3948 = vmatprep.subr.bf16.mxu1 %v4334_v52  ;;  %v4352_v41 = vld [vmem:[#allocation8 + $0x64] ss:$24 sps:$4 sm:$0xff]   ;;  %v4353_v48 = vld [vmem:[#allocation8 + $0x68] ss:$24 sps:$4 sm:$0xff]  }
 0x164   :  { %v4355_v42 = vld [vmem:[#allocation8 + $0x6c] ss:$24 sps:$4 sm:$0xff]   ;;  %v4356_v52 = vld [vmem:[#allocation8 + $0x90] ss:$24 sps:$4 sm:$0xff]  }
 0x165   :  { %v4358_v49 = vld [vmem:[#allocation8 + $0x94] ss:$24 sps:$4 sm:$0xff]  }
 0x166   :  { %3949 = vmatpush3.bf16.msra.mxu1 %v4335_v55  ;;  %v4367_v55 = vld [vmem:[#allocation8 + $0xcc] ss:$24 sps:$4 sm:$0xff]  }
 0x167   :  { %3950 = vmatprep.subr.bf16.mxu1 %v4336_v62  ;;  %v4376_v62 = vld [vmem:[#allocation8 + $0x124] ss:$24 sps:$4 sm:$0xff]  }
 0x16a   :  { %3951 = vmatpush3.bf16.msra.mxu1 %v4337_v0  ;;  %v4374_v0 = vld [vmem:[#allocation8 + $0x120] ss:$24 sps:$4 sm:$0xff]  }
 0x16b   :  { %3265 = vmatprep.subr.bf16.mxu1 %v4343_v37 }
 0x1a1   :  { %v1407_v54 = vpop.f32.mrb[0].mxu0 }
 0x1a2   :  { %v3959_v56 = vadd.f32 %v1407_v54, %v1326_v50  ;;  %v1409_v57 = vpop.f32.mrb[1].mxu0  ;;  %v4361_v50 = vld [vmem:[#allocation8 + $0x9c] ss:$24 sps:$4 sm:$0xff]  }
 0x1a3   :  { %v3961_v58 = vadd.f32 %v1409_v57, %v1328_v53  ;;  %v1411_v59 = vpop.f32.mrb[2].mxu0  ;;  %v4359_v53 = vld [vmem:[#allocation8 + $0x98] ss:$24 sps:$4 sm:$0xff]   ;;  %v4364_v54 = vld [vmem:[#allocation8 + $0xc4] ss:$24 sps:$4 sm:$0xff]  }
 0x1a4   :  { %v1537_v60 = vmax.f32 %v3959_v56, 0.0  ;;  %v1412_v61 = vpop.f32.mrb[3].mxu0  ;;  %v4362_v56 = vld [vmem:[#allocation8 + $0xc0] ss:$24 sps:$4 sm:$0xff]   ;;  %v4373_v59 = vld [vmem:[#allocation8 + $0xfc] ss:$24 sps:$4 sm:$0xff]  }
 0x1a5   :  { %v1538_v63 = vmax.f32 %v3961_v58, 0.0  ;;  %v4365_v57 = vld [vmem:[#allocation8 + $0xc8] ss:$24 sps:$4 sm:$0xff]   ;;  %v4370_v58 = vld [vmem:[#allocation8 + $0xf4] ss:$24 sps:$4 sm:$0xff]  }
 0x1a6   :  { %v1541_v2 = vpack.c.bf16 %v1537_v60, %v1537_v60  ;;  %v4368_v60 = vld [vmem:[#allocation8 + $0xf0] ss:$24 sps:$4 sm:$0xff]  }
 0x1a7   :  { %v1542_v1 = vpack.c.bf16 %v1538_v63, %v1538_v63  ;;  %v4371_v61 = vld [vmem:[#allocation8 + $0xf8] ss:$24 sps:$4 sm:$0xff]   ;;  %v4379_v63 = vld [vmem:[#allocation8 + $0x12c] ss:$24 sps:$4 sm:$0xff]  }
 0x1a9   :  { %1840 = vmatprep.mubr.bf16.mxu0 %v1542_v1  ;;  %v4377_v1 = vld [vmem:[#allocation8 + $0x128] ss:$24 sps:$4 sm:$0xff]  }
 0x1aa   :  { %1841 = vmatmul.mubr.bf16.vlgmr.msra.gmra.mrb[4].mxu0 %v1541_v2  ;;  %v4382_v2 = vld [vmem:[#allocation8 + $0x154] ss:$24 sps:$4 sm:$0xff]  }
 0x1ab   :  { %3184 = vmatpush1.bf16.msra.mxu0 %v4338_v33  ;;  %v1892_v33 = vld [vmem:[%s5047_s1] sm:$0xff] }
 0x1ac   :  { %3185 = vmatprep.subr.bf16.mxu0 %v4346_v38  ;;  %v4424_v38 = vld [vmem:[#allocation8 + $0x2a4] ss:$24 sps:$4 sm:$0xff]  }
 0x1af   :  { %3186 = vmatpush1.bf16.msra.mxu0 %v4344_v12  ;;  %v4422_v12 = vld [vmem:[#allocation8 + $0x2a0] ss:$24 sps:$4 sm:$0xff]  }
 0x1b0   :  { %3187 = vmatprep.subr.bf16.mxu0 %v4352_v41  ;;  %v4428_v41 = vld [vmem:[#allocation8 + $0x2d0] ss:$24 sps:$4 sm:$0xff]  }
 0x1b3   :  { %3188 = vmatpush1.bf16.msra.mxu0 %v4350_v43  ;;  %v4431_v43 = vld [vmem:[#allocation8 + $0x2d8] ss:$24 sps:$4 sm:$0xff]  }
 0x1b4   :  { %3189 = vmatprep.subr.bf16.mxu0 %v4358_v49  ;;  %v3721_v49 = vld [vmem:[%s5052_s6 + $0x1] ss:$2 sm:$0xf] }
 0x1b7   :  { %3190 = vmatpush1.bf16.msra.mxu0 %v4356_v52  ;;  %v1940_v52 = vrot.slane %v3721_v49, %v4938_v45 }
 0x1b8   :  { %3191 = vmatprep.subr.bf16.mxu0 %v4364_v54  ;;  %v1952_v54 = vrot.slane %v3721_v49, %v4952_v4 }
 0x1bb   :  { %3192 = vmatpush1.bf16.msra.mxu0 %v4362_v56 }
 0x1bc   :  { %3193 = vmatprep.subr.bf16.mxu0 %v4370_v58 }
 0x1bf   :  { %3194 = vmatpush1.bf16.msra.mxu0 %v4368_v60 }
 0x1c0   :  { %3195 = vmatprep.subr.bf16.mxu0 %v4376_v62 }
 0x1c3   :  { %3196 = vmatpush1.bf16.msra.mxu0 %v4374_v0 }
 0x1c4   :  { %3197 = vmatprep.subr.bf16.mxu0 %v4382_v2 }
 0x220   :  { %v1530_v34 = vpop.f32.mrb[4].mxu1 }
 0x221   :  { %v3962_v8 = vadd.f32 %v1530_v34, %v301_v7  ;;  %v1532_v9 = vpop.f32.mrb[5].mxu1  ;;  %v4385_v7 = vld [vmem:[#allocation8 + $0x15c] ss:$24 sps:$4 sm:$0xff]   ;;  %v4383_v34 = vld [vmem:[#allocation8 + $0x158] ss:$24 sps:$4 sm:$0xff]  }
 0x222   :  { %v3963_v10 = vadd.f32 %v1532_v9, %v305_v5  ;;  %v1534_v11 = vpop.f32.mrb[6].mxu1  ;;  %v4380_v5 = vld [vmem:[#allocation8 + $0x150] ss:$24 sps:$4 sm:$0xff]   ;;  %v4391_v9 = vld [vmem:[#allocation8 + $0x18c] ss:$24 sps:$4 sm:$0xff]  }
 0x223   :  { %v1539_v13 = vmax.f32 %v3962_v8, 0.0  ;;  %v1535_v14 = vpop.f32.mrb[7].mxu1  ;;  %v4388_v8 = vld [vmem:[#allocation8 + $0x184] ss:$24 sps:$4 sm:$0xff]   ;;  %3198 = vmatpush1.bf16.msra.mxu0 %v4380_v5  ;;  %v4389_v11 = vld [vmem:[#allocation8 + $0x188] ss:$24 sps:$4 sm:$0xff]  }
 0x224   :  { %v1540_v15 = vmax.f32 %v3963_v10, 0.0  ;;  %v4386_v10 = vld [vmem:[#allocation8 + $0x180] ss:$24 sps:$4 sm:$0xff]   ;;  %3199 = vmatprep.subr.bf16.mxu0 %v4388_v8  ;;  %v4397_v14 = vld [vmem:[#allocation8 + $0x1bc] ss:$24 sps:$4 sm:$0xff]  }
 0x225   :  { %v1543_v17 = vpack.c.bf16 %v1539_v13, %v1539_v13  ;;  %v4394_v13 = vld [vmem:[#allocation8 + $0x1b4] ss:$24 sps:$4 sm:$0xff]  }
 0x226   :  { %v1544_v16 = vpack.c.bf16 %v1540_v15, %v1540_v15  ;;  %v4392_v15 = vld [vmem:[#allocation8 + $0x1b0] ss:$24 sps:$4 sm:$0xff]  }
 0x227   :  { %3200 = vmatpush1.bf16.msra.mxu0 %v4386_v10 }
 0x228   :  { %1880 = vmatprep.mubr.bf16.mxu1 %v1544_v16  ;;  %3201 = vmatprep.subr.bf16.mxu0 %v4394_v13  ;;  %v4395_v16 = vld [vmem:[#allocation8 + $0x1b8] ss:$24 sps:$4 sm:$0xff]  }
 0x229   :  { %1881 = vmatmul.mubr.bf16.vlgmr.msra.gmra.mrb[8].mxu1 %v1543_v17  ;;  %v4400_v17 = vld [vmem:[#allocation8 + $0x1e4] ss:$24 sps:$4 sm:$0xff]  }
 0x22a   :  { %3266 = vmatpush1.bf16.msra.mxu1 %v4341_v36 }
 0x22b   :  { %3267 = vmatprep.subr.bf16.mxu1 %v4349_v39  ;;  %3202 = vmatpush1.bf16.msra.mxu0 %v4392_v15  ;;  %v4427_v39 = vld [vmem:[#allocation8 + $0x2ac] ss:$24 sps:$4 sm:$0xff]  }
 0x22c   :  { %3203 = vmatprep.subr.bf16.mxu0 %v4400_v17 }
 0x22e   :  { %3268 = vmatpush1.bf16.msra.mxu1 %v4347_v40  ;;  %v4425_v40 = vld [vmem:[#allocation8 + $0x2a8] ss:$24 sps:$4 sm:$0xff]  }
 0x22f   :  { %3269 = vmatprep.subr.bf16.mxu1 %v4355_v42  ;;  %v4430_v42 = vld [vmem:[#allocation8 + $0x2d4] ss:$24 sps:$4 sm:$0xff]  }
 0x232   :  { %3270 = vmatpush1.bf16.msra.mxu1 %v4353_v48  ;;  %v4439_v48 = vld [vmem:[#allocation8 + $0x30c] ss:$24 sps:$4 sm:$0xff]  }
 0x233   :  { %3271 = vmatprep.subr.bf16.mxu1 %v4361_v50  ;;  %v1899_v50 = vld [vmem:[%s5052_s6] ss:$2 sm:$0xf] }
 0x234   :  { %v1909_v56 = vrot.slane %v1899_v50, %v4938_v45  ;;  %v1917_v58 = vrot.slane %v1899_v50, %v4949_v3 }
 0x236   :  { %3272 = vmatpush1.bf16.msra.mxu1 %v4359_v53  ;;  %v1948_v53 = vrot.slane %v3721_v49, %v4949_v3 }
 0x237   :  { %3273 = vmatprep.subr.bf16.mxu1 %v4367_v55  ;;  %v1965_v55 = vld [vmem:[%s5053_s7] sm:$0xf] }
 0x238   :  { %v1978_v62 = vrot.slane %v1965_v55, %v4949_v3  ;;  %v1974_v0 = vrot.slane %v1965_v55, %v4944_v47 }
 0x23a   :  { %3274 = vmatpush1.bf16.msra.mxu1 %v4365_v57  ;;  %v1913_v57 = vrot.slane %v1899_v50, %v4944_v47 }
 0x23b   :  { %3275 = vmatprep.subr.bf16.mxu1 %v4373_v59  ;;  %v1921_v59 = vrot.slane %v1899_v50, %v4952_v4  ;;  %v4467_v50 = vld [vmem:[#allocation8 + $0x3f8] ss:$24 sps:$4 sm:$0xff]  }
 0x23e   :  { %3276 = vmatpush1.bf16.msra.mxu1 %v4371_v61  ;;  %v1970_v61 = vrot.slane %v1965_v55, %v4938_v45 }
 0x23f   :  { %3277 = vmatprep.subr.bf16.mxu1 %v4379_v63 }
 0x242   :  { %3278 = vmatpush1.bf16.msra.mxu1 %v4377_v1  ;;  %v1982_v1 = vrot.slane %v1965_v55, %v4952_v4  ;;  %v4478_v55 = vld [vmem:[#allocation8 + $0x454] ss:$24 sps:$4 sm:$0xff]  }
 0x243   :  { %3279 = vmatprep.subr.bf16.mxu1 %v4385_v7 }
 0x246   :  { %3280 = vmatpush1.bf16.msra.mxu1 %v4383_v34 }
 0x247   :  { %3281 = vmatprep.subr.bf16.mxu1 %v4391_v9 }
 0x24a   :  { %3282 = vmatpush1.bf16.msra.mxu1 %v4389_v11 }
 0x24b   :  { %3283 = vmatprep.subr.bf16.mxu1 %v4397_v14 }
 0x24e   :  { %3284 = vmatpush1.bf16.msra.mxu1 %v4395_v16 }
 0x27d   :  { %v3930_v18 = vpop.f32.mrb[4].mxu0 }
 0x27e   :  { %v3931_v19 = vpop.f32.mrb[5].mxu0 }
 0x27f   :  { %v3932_v20 = vadd.f32 %v3931_v19, %v3930_v18  ;;  %v3933_v21 = vpop.f32.mrb[6].mxu0  ;;  %v4403_v18 = vld [vmem:[#allocation8 + $0x1ec] ss:$24 sps:$4 sm:$0xff]   ;;  %v4398_v19 = vld [vmem:[#allocation8 + $0x1e0] ss:$24 sps:$4 sm:$0xff]  }
 0x280   :  { %v3934_v22 = vpop.f32.mrb[7].mxu0  ;;  %v4406_v21 = vld [vmem:[#allocation8 + $0x214] ss:$24 sps:$4 sm:$0xff]   ;;  %3285 = vmatprep.subr.bf16.mxu1 %v4403_v18  ;;  %3204 = vmatpush1.bf16.msra.mxu0 %v4398_v19 }
 0x281   :  { %v1843_v25 = vadd.f32 %v3932_v20, %v3688_v23  ;;  %v4401_v20 = vld [vmem:[#allocation8 + $0x1e8] ss:$24 sps:$4 sm:$0xff]   ;;  %v4409_v22 = vld [vmem:[#allocation8 + $0x21c] ss:$24 sps:$4 sm:$0xff]   ;;  %3205 = vmatprep.subr.bf16.mxu0 %v4406_v21 }
 0x282   :  { %v4404_v23 = vld [vmem:[#allocation8 + $0x210] ss:$24 sps:$4 sm:$0xff]   ;;  %3286 = vmatpush1.bf16.msra.mxu1 %v4401_v20 }
 0x283   :  { %3287 = vmatprep.subr.bf16.mxu1 %v4409_v22 }
 0x284   :  { %3206 = vmatpush1.bf16.msra.mxu0 %v4404_v23 }
 0x2fc   :  { %v3952_v24 = vpop.f32.mrb[8].mxu1 }
 0x2fd   :  { %v3953_v6 = vpop.f32.mrb[9].mxu1 }
 0x2fe   :  { %v3954_v51 = vadd.f32 %v3953_v6, %v3952_v24  ;;  %v3955_v26 = vpop.f32.mrb[10].mxu1  ;;  %v4407_v24 = vld [vmem:[#allocation8 + $0x218] ss:$24 sps:$4 sm:$0xff]   ;;  %v4412_v6 = vld [vmem:[#allocation8 + $0x244] ss:$24 sps:$4 sm:$0xff]  }
 0x2ff   :  { %v3956_v27 = vpop.f32.mrb[11].mxu1  ;;  %3288 = vmatpush1.bf16.msra.mxu1 %v4407_v24  ;;  %3207 = vmatprep.subr.bf16.mxu0 %v4412_v6  ;;  %v4413_v26 = vld [vmem:[#allocation8 + $0x248] ss:$24 sps:$4 sm:$0xff]  }
 0x300   :  { %v4959_v28 = vadd.f32 %v3954_v51, %v1843_v25  ;;  %v4415_v25 = vld [vmem:[#allocation8 + $0x24c] ss:$24 sps:$4 sm:$0xff]   ;;  %v4410_v51 = vld [vmem:[#allocation8 + $0x240] ss:$24 sps:$4 sm:$0xff]  }
 0x301   :  { %v4418_v27 = vld [vmem:[#allocation8 + $0x274] ss:$24 sps:$4 sm:$0xff]   ;;  %3289 = vmatprep.subr.bf16.mxu1 %v4415_v25  ;;  %3208 = vmatpush1.bf16.msra.mxu0 %v4410_v51  ;;  %v4434_v6 = vld [vmem:[#allocation8 + $0x300] ss:$24 sps:$4 sm:$0xff]  }
 0x302   :  { %v1889_v29 = vmul.f32 0.5, %v4959_v28  ;;  %1888 = vst [vmem:[#allocation11] sm:$0xff] %v4959_v28  ;;  %3209 = vmatprep.subr.bf16.mxu0 %v4418_v27  ;;  %v4437_v25 = vld [vmem:[#allocation8 + $0x308] ss:$24 sps:$4 sm:$0xff]   ;;  %v4445_v27 = vld [vmem:[#allocation8 + $0x33c] ss:$24 sps:$4 sm:$0xff]  }
 0x303   :  { %3290 = vmatpush1.bf16.msra.mxu1 %v4413_v26  ;;  %v4442_v26 = vld [vmem:[#allocation8 + $0x334] ss:$24 sps:$4 sm:$0xff]  }
 0x304   :  { %v1890_v30 = vmul.f32 1.442695, %v1889_v29  ;;  %v4421_v29 = vld [vmem:[#allocation8 + $0x27c] ss:$24 sps:$4 sm:$0xff]  }
 0x305   :  { %3291 = vmatprep.subr.bf16.mxu1 %v4421_v29 }
 0x306   :  { %4626 = vpow2.f32 %v1890_v30  ;;  %v4416_v30 = vld [vmem:[#allocation8 + $0x270] ss:$24 sps:$4 sm:$0xff]  }
 0x307   :  { %3210 = vmatpush1.bf16.msra.mxu0 %v4416_v30  ;;  %3292 = vmatpush1.bf16.msra.mxu1 %v4419_v32  ;;  %v4440_v30 = vld [vmem:[#allocation8 + $0x330] ss:$24 sps:$4 sm:$0xff]  }
 0x308   :  { %3211 = vmatprep.subr.bf16.mxu0 %v4424_v38  ;;  %3293 = vmatprep.subr.bf16.mxu1 %v4427_v39  ;;  %v4443_v32 = vld [vmem:[#allocation8 + $0x338] ss:$24 sps:$4 sm:$0xff]   ;;  %v4454_v38 = vld [vmem:[#allocation8 + $0x394] ss:$24 sps:$4 sm:$0xff]  }
 0x309   :  { %v4457_v39 = vld [vmem:[#allocation8 + $0x39c] ss:$24 sps:$4 sm:$0xff]  }
 0x30b   :  { %3212 = vmatpush1.bf16.msra.mxu0 %v4422_v12  ;;  %3294 = vmatpush1.bf16.msra.mxu1 %v4425_v40  ;;  %v4452_v12 = vld [vmem:[#allocation8 + $0x390] ss:$24 sps:$4 sm:$0xff]  }
 0x30c   :  { %3213 = vmatprep.subr.bf16.mxu0 %v4430_v42  ;;  %v4455_v40 = vld [vmem:[#allocation8 + $0x398] ss:$24 sps:$4 sm:$0xff]   ;;  %v4463_v42 = vld [vmem:[#allocation8 + $0x3cc] ss:$24 sps:$4 sm:$0xff]  }
 0x30f   :  { %3214 = vmatpush1.bf16.msra.mxu0 %v4428_v41  ;;  %v4460_v41 = vld [vmem:[#allocation8 + $0x3c4] ss:$24 sps:$4 sm:$0xff]  }
 0x310   :  { %v4627_v46 = vpop.eup %4626 }
 0x311   :  { %1894 = vrot.lane.b32.xlu0 %v4627_v46, %s4794_s5  ;;  %v4433_v46 = vld [vmem:[#allocation8 + $0x2dc] ss:$24 sps:$4 sm:$0xff]  }
 0x312   :  { %3295 = vmatprep.subr.bf16.mxu1 %v4433_v46  ;;  %v4461_v46 = vld [vmem:[#allocation8 + $0x3c8] ss:$24 sps:$4 sm:$0xff]  }
 0x313   :  { %3296 = vmatpush1.bf16.msra.mxu1 %v4431_v43  ;;  %v4458_v43 = vld [vmem:[#allocation8 + $0x3c0] ss:$24 sps:$4 sm:$0xff]  }
 0x314   :  { %3306 = vmatprep.subr.bf16.mxu1 %v4439_v48  ;;  %v4469_v48 = vld [vmem:[#allocation8 + $0x3fc] ss:$24 sps:$4 sm:$0xff]  }
 0x383   :  { %v1895_v35 = vpop.permute.xlu0 %1894 }
 0x384   :  { %v1897_v36 = vmul.f32 %v1895_v35, %v1892_v33  ;;  %v4448_v33 = vld [vmem:[#allocation8 + $0x364] ss:$24 sps:$4 sm:$0xff]  }
 0x385   :  { %v4451_v35 = vld [vmem:[#allocation8 + $0x36c] ss:$24 sps:$4 sm:$0xff]  }
 0x386   :  { %v1898_v37 = vadd.f32 %v1897_v36, %v4959_v28  ;;  %v4436_v28 = vld [vmem:[#allocation8 + $0x304] ss:$24 sps:$4 sm:$0xff]   ;;  %v4446_v36 = vld [vmem:[#allocation8 + $0x360] ss:$24 sps:$4 sm:$0xff]  }
 0x387   :  { %3224 = vmatprep.subr.bf16.mxu0 %v4436_v28  ;;  %v4466_v28 = vld [vmem:[#allocation8 + $0x3f4] ss:$24 sps:$4 sm:$0xff]  }
 0x388   :  { %1933 = vperm.xlu1 %4010, %v1898_v37   ;;  %1902 = vperm.xlu0 %4009, %v1898_v37   ;;  %v4449_v37 = vld [vmem:[#allocation8 + $0x368] ss:$24 sps:$4 sm:$0xff]  }
 0x38c   :  { %4011 = vset.pattern.permute.xlu0 %v4792_v31  ;;  %v1944_v31 = vrot.slane %v3721_v49, %v4944_v47  ;;  %v4464_v49 = vld [vmem:[#allocation8 + $0x3f0] ss:$24 sps:$4 sm:$0xff]  }
 0x407   :  { %v1934_v60 = vpop.permute.xlu1 %1933  ;;  %v1903_v63 = vpop.permute.xlu0 %1902 }
 0x408   :  { %v1957_v2 = vmul.f32 %v1940_v52, %v1934_v60  ;;  %v1958_v7 = vmul.f32 %v1944_v31, %v1934_v60  ;;  %v1959_v5 = vmul.f32 %v1948_v53, %v1934_v60  ;;  %v1960_v34 = vmul.f32 %v1952_v54, %v1934_v60  ;;  %v4472_v52 = vld [vmem:[#allocation8 + $0x424] ss:$24 sps:$4 sm:$0xff]   ;;  %v4470_v53 = vld [vmem:[#allocation8 + $0x420] ss:$24 sps:$4 sm:$0xff]  }
 0x409   :  { %v1926_v8 = vmul.f32 %v1909_v56, %v1903_v63  ;;  %v1927_v9 = vmul.f32 %v1913_v57, %v1903_v63  ;;  %v1928_v10 = vmul.f32 %v1917_v58, %v1903_v63  ;;  %v1929_v11 = vmul.f32 %v1921_v59, %v1903_v63  ;;  %v4475_v31 = vld [vmem:[#allocation8 + $0x42c] ss:$24 sps:$4 sm:$0xff]   ;;  %v4473_v54 = vld [vmem:[#allocation8 + $0x428] ss:$24 sps:$4 sm:$0xff]   ;;  %v4481_v56 = vld [vmem:[#allocation8 + $0x45c] ss:$24 sps:$4 sm:$0xff]  }
 0x40a   :  { %v4476_v57 = vld [vmem:[#allocation8 + $0x450] ss:$24 sps:$4 sm:$0xff]   ;;  %v4484_v59 = vld [vmem:[#allocation8 + $0x484] ss:$24 sps:$4 sm:$0xff]   ;;  %v4490_v63 = vld [vmem:[#allocation8 + $0x4b4] ss:$24 sps:$4 sm:$0xff]  }
 0x40b   :  { %v1961_v13 = vadd.f32 %v1957_v2, %v1926_v8  ;;  %v1962_v14 = vadd.f32 %v1958_v7, %v1927_v9  ;;  %v1963_v15 = vadd.f32 %v1959_v5, %v1928_v10  ;;  %v1964_v16 = vadd.f32 %v1960_v34, %v1929_v11  ;;  %v4479_v58 = vld [vmem:[#allocation8 + $0x458] ss:$24 sps:$4 sm:$0xff]   ;;  %v4487_v60 = vld [vmem:[#allocation8 + $0x48c] ss:$24 sps:$4 sm:$0xff]   ;;  %v4497_v8 = vld [vmem:[#allocation8 + $0x4e8] ss:$24 sps:$4 sm:$0xff]  }
 0x40c   :  { %v4491_v2 = vld [vmem:[#allocation8 + $0x4b8] ss:$24 sps:$4 sm:$0xff]   ;;  %v4496_v7 = vld [vmem:[#allocation8 + $0x4e4] ss:$24 sps:$4 sm:$0xff]   ;;  %v4502_v9 = vld [vmem:[#allocation8 + $0x514] ss:$24 sps:$4 sm:$0xff]  }
 0x40d   :  { %v1987_v17 = vadd.f32 %v1970_v61, %v1961_v13  ;;  %v4990_v18 = vadd.f32 %v1978_v62, %v1963_v15  ;;  %v1988_v19 = vadd.f32 %v1974_v0, %v1962_v14  ;;  %v1990_v20 = vadd.f32 %v1982_v1, %v1964_v16  ;;  %v4482_v61 = vld [vmem:[#allocation8 + $0x480] ss:$24 sps:$4 sm:$0xff]   ;;  %v4493_v0 = vld [vmem:[#allocation8 + $0x4bc] ss:$24 sps:$4 sm:$0xff]   ;;  %v4488_v1 = vld [vmem:[#allocation8 + $0x4b0] ss:$24 sps:$4 sm:$0xff]  }
 0x40e   :  { %v4485_v62 = vld [vmem:[#allocation8 + $0x488] ss:$24 sps:$4 sm:$0xff]   ;;  %v4499_v5 = vld [vmem:[#allocation8 + $0x4ec] ss:$24 sps:$4 sm:$0xff]   ;;  %v4505_v10 = vld [vmem:[#allocation8 + $0x51c] ss:$24 sps:$4 sm:$0xff]  }
 0x40f   :  { %v1992_v21 = vmax.f32 %v1988_v19, 0.0  ;;  %v1991_v22 = vmax.f32 %v1987_v17, 0.0  ;;  %v1994_v23 = vmax.f32 %v1990_v20, 0.0  ;;  %v4494_v34 = vld [vmem:[#allocation8 + $0x4e0] ss:$24 sps:$4 sm:$0xff]  }
 0x410   :  { %v4500_v11 = vld [vmem:[#allocation8 + $0x510] ss:$24 sps:$4 sm:$0xff]   ;;  %v4508_v14 = vld [vmem:[#allocation8 + $0x544] ss:$24 sps:$4 sm:$0xff]   ;;  %v4506_v16 = vld [vmem:[#allocation8 + $0x540] ss:$24 sps:$4 sm:$0xff]  }
 0x411   :  { %v4992_v24 = vpack.c.bf16 %v1992_v21, %v1992_v21  ;;  %v4994_v51 = vpack.c.bf16 %v1991_v22, %v1991_v22  ;;  %v5000_v29 = vpack.c.bf16 %v1994_v23, %v1994_v23  ;;  %v4503_v13 = vld [vmem:[#allocation8 + $0x518] ss:$24 sps:$4 sm:$0xff]   ;;  %v4511_v15 = vld [vmem:[#allocation8 + $0x54c] ss:$24 sps:$4 sm:$0xff]   ;;  %v4509_v17 = vld [vmem:[#allocation8 + $0x548] ss:$24 sps:$4 sm:$0xff]  }
 0x412   :  { %v4514_v19 = vld [vmem:[#allocation8 + $0x574] ss:$24 sps:$4 sm:$0xff]   ;;  %v4512_v21 = vld [vmem:[#allocation8 + $0x570] ss:$24 sps:$4 sm:$0xff]   ;;  %v4520_v23 = vld [vmem:[#allocation8 + $0x5a4] ss:$24 sps:$4 sm:$0xff]  }
 0x413   :  { %3215 = vmatprep.mubr.bf16.mxu0 %v4992_v24  ;;  %3297 = vmatprep.mubr.bf16.mxu1 %v4992_v24  ;;  %v4517_v20 = vld [vmem:[#allocation8 + $0x57c] ss:$24 sps:$4 sm:$0xff]   ;;  %v4515_v22 = vld [vmem:[#allocation8 + $0x578] ss:$24 sps:$4 sm:$0xff]  }
 0x414   :  { %3216 = vmatmul.mubr.bf16.vlgmr.msra.gmra.mrb[8].mxu0 %v4994_v51  ;;  %3298 = vmatmul.mubr.bf16.vlgmr.msra.gmra.mrb[12].mxu1 %v4994_v51 }
 0x415   :  { %3225 = vmatpush1.bf16.msra.mxu0 %v4434_v6  ;;  %3307 = vmatpush1.bf16.msra.mxu1 %v4437_v25  ;;  %v4523_v6 = vld [vmem:[#allocation8 + $0x5ac] ss:$24 sps:$4 sm:$0xff]   ;;  %v4518_v25 = vld [vmem:[#allocation8 + $0x5a0] ss:$24 sps:$4 sm:$0xff]  }
 0x416   :  { %3256 = vmatprep.mubr.bf16.mxu0 %v5000_v29  ;;  %3338 = vmatprep.mubr.bf16.mxu1 %v5000_v29 }
 0x417   :  { %3226 = vmatprep.subr.bf16.mxu0 %v4442_v26  ;;  %3308 = vmatprep.subr.bf16.mxu1 %v4445_v27  ;;  %v4521_v26 = vld [vmem:[#allocation8 + $0x5a8] ss:$24 sps:$4 sm:$0xff]   ;;  %v4526_v27 = vld [vmem:[#allocation8 + $0x5d4] ss:$24 sps:$4 sm:$0xff]  }
 0x419   :  { %3227 = vmatpush1.bf16.msra.mxu0 %v4440_v30  ;;  %3309 = vmatpush1.bf16.msra.mxu1 %v4443_v32  ;;  %v4529_v30 = vld [vmem:[#allocation8 + $0x5dc] ss:$24 sps:$4 sm:$0xff]   ;;  %v4524_v32 = vld [vmem:[#allocation8 + $0x5d0] ss:$24 sps:$4 sm:$0xff]  }
 0x41a   :  { %3228 = vmatprep.subr.bf16.mxu0 %v4448_v33  ;;  %3310 = vmatprep.subr.bf16.mxu1 %v4451_v35  ;;  %v4527_v33 = vld [vmem:[#allocation8 + $0x5d8] ss:$24 sps:$4 sm:$0xff]   ;;  %v1993_v35 = vmax.f32 %v4990_v18, 0.0 }
 0x41b   :  { %v4536_v18 = vld [vmem:[#allocation8 + $0x70] ss:$24 sps:$4 sm:$0xff]  }
 0x41d   :  { %3229 = vmatpush1.bf16.msra.mxu0 %v4446_v36  ;;  %3311 = vmatpush1.bf16.msra.mxu1 %v4449_v37  ;;  %v4532_v36 = vld [vmem:[#allocation8 + $0x14] ss:$24 sps:$4 sm:$0xff]   ;;  %v4530_v37 = vld [vmem:[#allocation8 + $0x10] ss:$24 sps:$4 sm:$0xff]  }
 0x41e   :  { %3230 = vmatprep.subr.bf16.mxu0 %v4454_v38  ;;  %3312 = vmatprep.subr.bf16.mxu1 %v4457_v39  ;;  %v5005_v38 = vpack.c.bf16 %v1993_v35, %v1993_v35  ;;  %v4535_v39 = vld [vmem:[#allocation8 + $0x44] ss:$24 sps:$4 sm:$0xff]   ;;  %v4614_v35 = vld [vmem:[#allocation8 + $0x550] ss:$24 sps:$4 sm:$0xff]  }
 0x421   :  { %3231 = vmatpush1.bf16.msra.mxu0 %v4452_v12  ;;  %3313 = vmatpush1.bf16.msra.mxu1 %v4455_v40  ;;  %v4533_v12 = vld [vmem:[#allocation8 + $0x40] ss:$24 sps:$4 sm:$0xff]   ;;  %v4538_v40 = vld [vmem:[#allocation8 + $0x74] ss:$24 sps:$4 sm:$0xff]  }
 0x422   :  { %3232 = vmatprep.subr.bf16.mxu0 %v4460_v41  ;;  %3314 = vmatprep.subr.bf16.mxu1 %v4463_v42  ;;  %v4541_v41 = vld [vmem:[#allocation8 + $0xa4] ss:$24 sps:$4 sm:$0xff]   ;;  %v4539_v42 = vld [vmem:[#allocation8 + $0xa0] ss:$24 sps:$4 sm:$0xff]  }
 0x425   :  { %3233 = vmatpush1.bf16.msra.mxu0 %v4458_v43  ;;  %3315 = vmatpush1.bf16.msra.mxu1 %v4461_v46  ;;  %v4544_v43 = vld [vmem:[#allocation8 + $0xd4] ss:$24 sps:$4 sm:$0xff]   ;;  %v4542_v46 = vld [vmem:[#allocation8 + $0xd0] ss:$24 sps:$4 sm:$0xff]  }
 0x426   :  { %3234 = vmatprep.subr.bf16.mxu0 %v4466_v28  ;;  %3316 = vmatprep.subr.bf16.mxu1 %v4469_v48  ;;  %v4547_v28 = vld [vmem:[#allocation8 + $0x104] ss:$24 sps:$4 sm:$0xff]   ;;  %v4545_v48 = vld [vmem:[#allocation8 + $0x100] ss:$24 sps:$4 sm:$0xff]  }
 0x429   :  { %3235 = vmatpush1.bf16.msra.mxu0 %v4464_v49  ;;  %3317 = vmatpush1.bf16.msra.mxu1 %v4467_v50  ;;  %v4550_v49 = vld [vmem:[#allocation8 + $0x134] ss:$24 sps:$4 sm:$0xff]   ;;  %v4553_v50 = vld [vmem:[#allocation8 + $0x164] ss:$24 sps:$4 sm:$0xff]  }
 0x42a   :  { %3236 = vmatprep.subr.bf16.mxu0 %v4472_v52  ;;  %3318 = vmatprep.subr.bf16.mxu1 %v4475_v31  ;;  %v4551_v52 = vld [vmem:[#allocation8 + $0x160] ss:$24 sps:$4 sm:$0xff]   ;;  %v4556_v31 = vld [vmem:[#allocation8 + $0x194] ss:$24 sps:$4 sm:$0xff]  }
 0x42d   :  { %3237 = vmatpush1.bf16.msra.mxu0 %v4470_v53  ;;  %3319 = vmatpush1.bf16.msra.mxu1 %v4473_v54  ;;  %v4554_v53 = vld [vmem:[#allocation8 + $0x190] ss:$24 sps:$4 sm:$0xff]   ;;  %v4559_v54 = vld [vmem:[#allocation8 + $0x1c4] ss:$24 sps:$4 sm:$0xff]  }
 0x42e   :  { %3238 = vmatprep.subr.bf16.mxu0 %v4478_v55  ;;  %3320 = vmatprep.subr.bf16.mxu1 %v4481_v56  ;;  %v4557_v55 = vld [vmem:[#allocation8 + $0x1c0] ss:$24 sps:$4 sm:$0xff]   ;;  %v4562_v56 = vld [vmem:[#allocation8 + $0x1f4] ss:$24 sps:$4 sm:$0xff]  }
 0x431   :  { %3239 = vmatpush1.bf16.msra.mxu0 %v4476_v57  ;;  %3321 = vmatpush1.bf16.msra.mxu1 %v4479_v58  ;;  %v4560_v57 = vld [vmem:[#allocation8 + $0x1f0] ss:$24 sps:$4 sm:$0xff]   ;;  %v4565_v58 = vld [vmem:[#allocation8 + $0x224] ss:$24 sps:$4 sm:$0xff]  }
 0x432   :  { %3240 = vmatprep.subr.bf16.mxu0 %v4484_v59  ;;  %3322 = vmatprep.subr.bf16.mxu1 %v4487_v60  ;;  %v4563_v59 = vld [vmem:[#allocation8 + $0x220] ss:$24 sps:$4 sm:$0xff]   ;;  %v4568_v60 = vld [vmem:[#allocation8 + $0x254] ss:$24 sps:$4 sm:$0xff]  }
 0x435   :  { %3241 = vmatpush1.bf16.msra.mxu0 %v4482_v61  ;;  %3323 = vmatpush1.bf16.msra.mxu1 %v4485_v62  ;;  %v4566_v61 = vld [vmem:[#allocation8 + $0x250] ss:$24 sps:$4 sm:$0xff]   ;;  %v4571_v62 = vld [vmem:[#allocation8 + $0x284] ss:$24 sps:$4 sm:$0xff]  }
 0x436   :  { %3242 = vmatprep.subr.bf16.mxu0 %v4490_v63  ;;  %3324 = vmatprep.subr.bf16.mxu1 %v4493_v0  ;;  %v4569_v63 = vld [vmem:[#allocation8 + $0x280] ss:$24 sps:$4 sm:$0xff]   ;;  %v4574_v0 = vld [vmem:[#allocation8 + $0x2b4] ss:$24 sps:$4 sm:$0xff]  }
 0x439   :  { %3243 = vmatpush1.bf16.msra.mxu0 %v4488_v1  ;;  %3325 = vmatpush1.bf16.msra.mxu1 %v4491_v2  ;;  %v4572_v1 = vld [vmem:[#allocation8 + $0x2b0] ss:$24 sps:$4 sm:$0xff]   ;;  %v4577_v2 = vld [vmem:[#allocation8 + $0x2e4] ss:$24 sps:$4 sm:$0xff]  }
 0x43a   :  { %3244 = vmatprep.subr.bf16.mxu0 %v4496_v7  ;;  %3326 = vmatprep.subr.bf16.mxu1 %v4499_v5  ;;  %v4575_v7 = vld [vmem:[#allocation8 + $0x2e0] ss:$24 sps:$4 sm:$0xff]   ;;  %v4580_v5 = vld [vmem:[#allocation8 + $0x314] ss:$24 sps:$4 sm:$0xff]  }
 0x43d   :  { %3245 = vmatpush1.bf16.msra.mxu0 %v4494_v34  ;;  %3327 = vmatpush1.bf16.msra.mxu1 %v4497_v8  ;;  %v4578_v34 = vld [vmem:[#allocation8 + $0x310] ss:$24 sps:$4 sm:$0xff]   ;;  %v4583_v8 = vld [vmem:[#allocation8 + $0x344] ss:$24 sps:$4 sm:$0xff]  }
 0x43e   :  { %3246 = vmatprep.subr.bf16.mxu0 %v4502_v9  ;;  %3328 = vmatprep.subr.bf16.mxu1 %v4505_v10  ;;  %v4581_v9 = vld [vmem:[#allocation8 + $0x340] ss:$24 sps:$4 sm:$0xff]   ;;  %v4586_v10 = vld [vmem:[#allocation8 + $0x374] ss:$24 sps:$4 sm:$0xff]  }
 0x441   :  { %3247 = vmatpush1.bf16.msra.mxu0 %v4500_v11  ;;  %3329 = vmatpush1.bf16.msra.mxu1 %v4503_v13  ;;  %v4584_v11 = vld [vmem:[#allocation8 + $0x370] ss:$24 sps:$4 sm:$0xff]   ;;  %v4589_v13 = vld [vmem:[#allocation8 + $0x3a4] ss:$24 sps:$4 sm:$0xff]  }
 0x442   :  { %3248 = vmatprep.subr.bf16.mxu0 %v4508_v14  ;;  %3330 = vmatprep.subr.bf16.mxu1 %v4511_v15  ;;  %v4587_v14 = vld [vmem:[#allocation8 + $0x3a0] ss:$24 sps:$4 sm:$0xff]   ;;  %v4592_v15 = vld [vmem:[#allocation8 + $0x3d4] ss:$24 sps:$4 sm:$0xff]  }
 0x445   :  { %3249 = vmatpush1.bf16.msra.mxu0 %v4506_v16  ;;  %3331 = vmatpush1.bf16.msra.mxu1 %v4509_v17  ;;  %v4590_v16 = vld [vmem:[#allocation8 + $0x3d0] ss:$24 sps:$4 sm:$0xff]   ;;  %v4595_v17 = vld [vmem:[#allocation8 + $0x404] ss:$24 sps:$4 sm:$0xff]  }
 0x446   :  { %3250 = vmatprep.subr.bf16.mxu0 %v4514_v19  ;;  %3332 = vmatprep.subr.bf16.mxu1 %v4517_v20  ;;  %v4598_v19 = vld [vmem:[#allocation8 + $0x434] ss:$24 sps:$4 sm:$0xff]   ;;  %v4601_v20 = vld [vmem:[#allocation8 + $0x464] ss:$24 sps:$4 sm:$0xff]  }
 0x449   :  { %3251 = vmatpush1.bf16.msra.mxu0 %v4512_v21  ;;  %3333 = vmatpush1.bf16.msra.mxu1 %v4515_v22  ;;  %v4599_v21 = vld [vmem:[#allocation8 + $0x460] ss:$24 sps:$4 sm:$0xff]   ;;  %v4604_v22 = vld [vmem:[#allocation8 + $0x494] ss:$24 sps:$4 sm:$0xff]  }
 0x44a   :  { %3252 = vmatprep.subr.bf16.mxu0 %v4520_v23  ;;  %3334 = vmatprep.subr.bf16.mxu1 %v4523_v6  ;;  %v4602_v23 = vld [vmem:[#allocation8 + $0x490] ss:$24 sps:$4 sm:$0xff]   ;;  %v4607_v6 = vld [vmem:[#allocation8 + $0x4c4] ss:$24 sps:$4 sm:$0xff]  }
 0x44d   :  { %3253 = vmatpush1.bf16.msra.mxu0 %v4518_v25  ;;  %3335 = vmatpush1.bf16.msra.mxu1 %v4521_v26  ;;  %v4605_v25 = vld [vmem:[#allocation8 + $0x4c0] ss:$24 sps:$4 sm:$0xff]   ;;  %v4610_v26 = vld [vmem:[#allocation8 + $0x4f4] ss:$24 sps:$4 sm:$0xff]  }
 0x44e   :  { %3254 = vmatprep.subr.bf16.mxu0 %v4526_v27  ;;  %3336 = vmatprep.subr.bf16.mxu1 %v4529_v30  ;;  %v4608_v27 = vld [vmem:[#allocation8 + $0x4f0] ss:$24 sps:$4 sm:$0xff]   ;;  %v4613_v30 = vld [vmem:[#allocation8 + $0x524] ss:$24 sps:$4 sm:$0xff]  }
 0x451   :  { %3255 = vmatpush1.bf16.msra.mxu0 %v4524_v32  ;;  %3337 = vmatpush1.bf16.msra.mxu1 %v4527_v33  ;;  %v4611_v32 = vld [vmem:[#allocation8 + $0x520] ss:$24 sps:$4 sm:$0xff]   ;;  %v4616_v33 = vld [vmem:[#allocation8 + $0x554] ss:$24 sps:$4 sm:$0xff]  }
 0x452   :  { %3347 = vmatprep.subr.bf16.mxu0 %v4532_v36  ;;  %v4619_v36 = vld [vmem:[#allocation8 + $0x584] ss:$24 sps:$4 sm:$0xff]  }
 0x454   :  { %3257 = vmatmul.mubr.bf16.vlgmr.msra.gmra.mrb[8].mxu0 %v5005_v38  ;;  %3339 = vmatmul.mubr.bf16.vlgmr.msra.gmra.mrb[12].mxu1 %v5005_v38 }
 0x455   :  { %3348 = vmatpush1.bf16.msra.mxu0 %v4530_v37  ;;  %3379 = vmatprep.mubr.bf16.mxu0 %v4992_v24  ;;  %v4548_v24 = vld [vmem:[#allocation8 + $0x130] ss:$24 sps:$4 sm:$0xff]   ;;  %v4617_v37 = vld [vmem:[#allocation8 + $0x580] ss:$24 sps:$4 sm:$0xff]  }
 0x456   :  { %3349 = vmatprep.subr.bf16.mxu0 %v4535_v39  ;;  %v4622_v39 = vld [vmem:[#allocation8 + $0x5b4] ss:$24 sps:$4 sm:$0xff]  }
 0x459   :  { %3350 = vmatpush1.bf16.msra.mxu0 %v4533_v12  ;;  %v4620_v12 = vld [vmem:[#allocation8 + $0x5b0] ss:$24 sps:$4 sm:$0xff]  }
 0x45a   :  { %3351 = vmatprep.subr.bf16.mxu0 %v4538_v40  ;;  %v4625_v40 = vld [vmem:[#allocation8 + $0x5e4] ss:$24 sps:$4 sm:$0xff]  }
 0x45d   :  { %3352 = vmatpush1.bf16.msra.mxu0 %v4536_v18  ;;  %v4623_v18 = vld [vmem:[#allocation8 + $0x5e0] ss:$24 sps:$4 sm:$0xff]  }
 0x45e   :  { %3353 = vmatprep.subr.bf16.mxu0 %v4541_v41  ;;  %v2191_v41 = vld [vmem:[%s5055_s9] sm:$0x3f]  ;;  %s4795_s9 = smov [#allocation11]  }
 0x45f   :  { %s3475_s20 = sshll.u32 %s4795_s9, 4  ;;  %s3476_s20 = int_to_ptr.vmem [resolvable:$true] %s3475_s20 }
 0x460   :  { %s4728_s21 = scalar_lea.vmem %s3476_s20, 128  ;;  %p4733_p5 = scmp.lt.s32.totalorder %s3476_s20, %s3476_s20 }
 0x461   :  { %3354 = vmatpush1.bf16.msra.mxu0 %v4539_v42  ;;  %v2196_v42 = vrot.slane %v2191_v41, %v4938_v45  ;;  %p4729_p4 = scmp.ne.s32.totalorder %s3476_s20, %s4728_s21  ;;  %p4734_p6 = scmp.lt.s32.totalorder %s4728_s21, %s4728_s21 }
 0x462   :  { %3355 = vmatprep.subr.bf16.mxu0 %v4544_v43  ;;  %v2204_v43 = vrot.slane %v2191_v41, %v4949_v3 }
 0x463   :  { %p4735_p7 = por %p4734_p6, %p4733_p5 }
 0x465   :  { %3356 = vmatpush1.bf16.msra.mxu0 %v4542_v46  ;;  %v2200_v46 = vrot.slane %v2191_v41, %v4944_v47  ;;  %p4736_p8 = pnand %p4735_p7, %p4729_p4 }
 0x466   :  { %3357 = vmatprep.subr.bf16.mxu0 %v4547_v28  ;;  %v2208_v28 = vrot.slane %v2191_v41, %v4952_v4 }
 0x469   :  { %3358 = vmatpush1.bf16.msra.mxu0 %v4545_v48 }
 0x46a   :  { %3359 = vmatprep.subr.bf16.mxu0 %v4550_v49 }
 0x46d   :  { %3360 = vmatpush1.bf16.msra.mxu0 %v4548_v24 }
 0x46e   :  { %3361 = vmatprep.subr.bf16.mxu0 %v4553_v50 }
 0x471   :  { %3362 = vmatpush1.bf16.msra.mxu0 %v4551_v52 }
 0x472   :  { %3363 = vmatprep.subr.bf16.mxu0 %v4556_v31 }
 0x475   :  { %3364 = vmatpush1.bf16.msra.mxu0 %v4554_v53 }
 0x476   :  { %3365 = vmatprep.subr.bf16.mxu0 %v4559_v54 }
 0x479   :  { %3366 = vmatpush1.bf16.msra.mxu0 %v4557_v55 }
 0x47a   :  { %3367 = vmatprep.subr.bf16.mxu0 %v4562_v56 }
 0x47d   :  { %3368 = vmatpush1.bf16.msra.mxu0 %v4560_v57 }
 0x47e   :  { %3369 = vmatprep.subr.bf16.mxu0 %v4565_v58 }
 0x481   :  { %3370 = vmatpush1.bf16.msra.mxu0 %v4563_v59 }
 0x482   :  { %3371 = vmatprep.subr.bf16.mxu0 %v4568_v60 }
 0x485   :  { %3372 = vmatpush1.bf16.msra.mxu0 %v4566_v61 }
 0x486   :  { %3373 = vmatprep.subr.bf16.mxu0 %v4571_v62 }
 0x489   :  { %3374 = vmatpush1.bf16.msra.mxu0 %v4569_v63 }
 0x48a   :  { %3375 = vmatprep.subr.bf16.mxu0 %v4574_v0 }
 0x48d   :  { %3376 = vmatpush1.bf16.msra.mxu0 %v4572_v1 }
 0x48e   :  { %3377 = vmatprep.subr.bf16.mxu0 %v4577_v2 }
 0x491   :  { %3378 = vmatpush1.bf16.msra.mxu0 %v4575_v7 }
 0x492   :  { %3388 = vmatprep.subr.bf16.mxu0 %v4580_v5 }
 0x494   :  { %3380 = vmatmul.mubr.bf16.vlgmr.msra.gmra.mrb[12].mxu0 %v4994_v51  ;;  %v4593_v51 = vld [vmem:[#allocation8 + $0x400] ss:$24 sps:$4 sm:$0xff]  }
 0x495   :  { %3389 = vmatpush1.bf16.msra.mxu0 %v4578_v34  ;;  %3420 = vmatprep.mubr.bf16.mxu0 %v5000_v29  ;;  %v4596_v29 = vld [vmem:[#allocation8 + $0x430] ss:$24 sps:$4 sm:$0xff]  }
 0x496   :  { %3390 = vmatprep.subr.bf16.mxu0 %v4583_v8 }
 0x499   :  { %3391 = vmatpush1.bf16.msra.mxu0 %v4581_v9 }
 0x49a   :  { %3392 = vmatprep.subr.bf16.mxu0 %v4586_v10 }
 0x49d   :  { %3393 = vmatpush1.bf16.msra.mxu0 %v4584_v11 }
 0x49e   :  { %3394 = vmatprep.subr.bf16.mxu0 %v4589_v13 }
 0x4a1   :  { %3395 = vmatpush1.bf16.msra.mxu0 %v4587_v14 }
 0x4a2   :  { %3396 = vmatprep.subr.bf16.mxu0 %v4592_v15 }
 0x4a5   :  { %3397 = vmatpush1.bf16.msra.mxu0 %v4590_v16 }
 0x4a6   :  { %3398 = vmatprep.subr.bf16.mxu0 %v4595_v17 }
 0x4a9   :  { %3399 = vmatpush1.bf16.msra.mxu0 %v4593_v51 }
 0x4aa   :  { %3400 = vmatprep.subr.bf16.mxu0 %v4598_v19 }
 0x4ad   :  { %3401 = vmatpush1.bf16.msra.mxu0 %v4596_v29 }
 0x4ae   :  { %3402 = vmatprep.subr.bf16.mxu0 %v4601_v20 }
 0x4b1   :  { %3403 = vmatpush1.bf16.msra.mxu0 %v4599_v21 }
 0x4b2   :  { %3404 = vmatprep.subr.bf16.mxu0 %v4604_v22 }
 0x4b5   :  { %3405 = vmatpush1.bf16.msra.mxu0 %v4602_v23 }
 0x4b6   :  { %3406 = vmatprep.subr.bf16.mxu0 %v4607_v6 }
 0x4b9   :  { %3407 = vmatpush1.bf16.msra.mxu0 %v4605_v25 }
 0x4ba   :  { %3408 = vmatprep.subr.bf16.mxu0 %v4610_v26 }
 0x4bd   :  { %3409 = vmatpush1.bf16.msra.mxu0 %v4608_v27 }
 0x4be   :  { %3410 = vmatprep.subr.bf16.mxu0 %v4613_v30 }
 0x4c1   :  { %3411 = vmatpush1.bf16.msra.mxu0 %v4611_v32 }
 0x4c2   :  { %3412 = vmatprep.subr.bf16.mxu0 %v4616_v33 }
 0x4c5   :  { %3413 = vmatpush1.bf16.msra.mxu0 %v4614_v35 }
 0x4c6   :  { %3414 = vmatprep.subr.bf16.mxu0 %v4619_v36 }
 0x4c9   :  { %3415 = vmatpush1.bf16.msra.mxu0 %v4617_v37 }
 0x4ca   :  { %3416 = vmatprep.subr.bf16.mxu0 %v4622_v39 }
 0x4cd   :  { %3417 = vmatpush1.bf16.msra.mxu0 %v4620_v12 }
 0x4ce   :  { %3418 = vmatprep.subr.bf16.mxu0 %v4625_v40 }
 0x4d1   :  { %3419 = vmatpush1.bf16.msra.mxu0 %v4623_v18 }
 0x4d4   :  { %3421 = vmatmul.mubr.bf16.vlgmr.msra.gmra.mrb[12].mxu0 %v5005_v38 }
 0x527   :  { %v3258_v48 = vpop.f32.mrb[8].mxu0  ;;  %v3340_v49 = vpop.f32.mrb[12].mxu1 }
 0x528   :  { %v3964_v24 = vadd.f32 %v3258_v48, %v2196_v42  ;;  %v3966_v50 = vadd.f32 %v3340_v49, %v2204_v43  ;;  %v3260_v52 = vpop.f32.mrb[9].mxu0  ;;  %v3342_v31 = vpop.f32.mrb[13].mxu1 }
 0x529   :  { %v3965_v53 = vadd.f32 %v3260_v52, %v2200_v46  ;;  %v3967_v38 = vadd.f32 %v3342_v31, %v2208_v28  ;;  %v3262_v54 = vpop.f32.mrb[10].mxu0  ;;  %v3344_v55 = vpop.f32.mrb[14].mxu1 }
 0x52a   :  { %v3429_v56 = vmul.f32 0.5, %v3964_v24  ;;  %v3431_v57 = vmul.f32 0.5, %v3966_v50  ;;  %v3263_v58 = vpop.f32.mrb[11].mxu0  ;;  %v3345_v45 = vpop.f32.mrb[15].mxu1 }
 0x52b   :  { %v3430_v59 = vmul.f32 0.5, %v3965_v53  ;;  %v3432_v3 = vmul.f32 0.5, %v3967_v38 }
 0x52c   :  { %4628 = vtanh.f32 %v3429_v56 }
 0x52d   :  { %4630 = vtanh.f32 %v3431_v57 }
 0x52e   :  { %4632 = vtanh.f32 %v3430_v59 }
 0x52f   :  { %4634 = vtanh.f32 %v3432_v3 }
 0x536   :  { %v4629_v47 = vpop.eup %4628 }
 0x537   :  { %v4631_v4 = vpop.eup %4630  ;;  %v3441_v60 = vmul.f32 0.5, %v4629_v47 }
 0x538   :  { %v4633_v61 = vpop.eup %4632  ;;  %v3443_v62 = vmul.f32 0.5, %v4631_v4 }
 0x539   :  { %v4635_v63 = vpop.eup %4634  ;;  %v3447_v0 = vadd.f32 0.5, %v3441_v60  ;;  %v3442_v1 = vmul.f32 0.5, %v4633_v61 }
 0x53a   :  { %v3449_v2 = vadd.f32 0.5, %v3443_v62  ;;  %v3444_v7 = vmul.f32 0.5, %v4635_v63 }
 0x53b   :  { %3453 = vst [vmem:[#allocation10] sm:$0xff] %v3447_v0  ;;  %v3448_v5 = vadd.f32 0.5, %v3442_v1 }
 0x53c   :  { %3455 = vst [vmem:[#allocation10 + $0x10] sm:$0xff] %v3449_v2  ;;  %v3450_v34 = vadd.f32 0.5, %v3444_v7 }
 0x53d   :  { %3454 = vst [vmem:[#allocation10 + $0x8] sm:$0xff] %v3448_v5 }
 0x53e   :  { %3456 = vst [vmem:[#allocation10 + $0x18] sm:$0xff] %v3450_v34 }
 0x53f   :  { %4739 = shalt.err (!%p4736_p8)
}
 0x540   :  { %s4740_s2 = scalar_lea.hbm %s5057_s11, 128 }
 0x541   :  { %p4741_p9 = scmp.ne.s32.totalorder %s5057_s11, %s4740_s2  ;;  %p4744_p10 = scmp.lt.u32.totalorder %s4740_s2, %s5057_s11 }
 0x543   :  { %p4746_p11 = pnand %p4744_p10, %p4741_p9 }
 0x545   :  { %4749 = shalt.err (!%p4746_p11)
}
 0x546   :  { %3478 = dma.vmem_to_hbm [thread:$0]  %s3476_s20, 128, %s5057_s11, [#allocation12]   ;;  %v2211_v8 = vsub.s32 4, %v4935_v44  ;;  %v2215_v9 = vsub.s32 5, %v4935_v44 }
 0x547   :  { %s4796_s11 = smov [#allocation10]  }
 0x548   :  { %v2212_v10 = vrot.slane %v2191_v41, %v2211_v8  ;;  %v2216_v11 = vrot.slane %v2191_v41, %v2215_v9  ;;  %s3465_s27 = sshll.u32 %s4796_s11, 4  ;;  %s3466_s27 = int_to_ptr.vmem [resolvable:$true] %s3465_s27 }
 0x549   :  { %s4750_s28 = scalar_lea.vmem %s3466_s27, 768  ;;  %p4755_p13 = scmp.lt.s32.totalorder %s3466_s27, %s3466_s27 }
 0x54a   :  { %p4751_p12 = scmp.ne.s32.totalorder %s3466_s27, %s4750_s28  ;;  %p4756_p0 = scmp.lt.s32.totalorder %s4750_s28, %s4750_s28 }
 0x54c   :  { %p4757_p1 = por %p4756_p0, %p4755_p13 }
 0x54e   :  { %p4758_p2 = pnand %p4757_p1, %p4751_p12 }
 0x5a7   :  { %v3422_v13 = vpop.f32.mrb[12].mxu0 }
 0x5a8   :  { %v3968_v14 = vadd.f32 %v3422_v13, %v2212_v10  ;;  %v3424_v15 = vpop.f32.mrb[13].mxu0 }
 0x5a9   :  { %v3969_v16 = vadd.f32 %v3424_v15, %v2216_v11  ;;  %v3426_v17 = vpop.f32.mrb[14].mxu0 }
 0x5aa   :  { %v3433_v51 = vmul.f32 0.5, %v3968_v14  ;;  %v3427_v19 = vpop.f32.mrb[15].mxu0 }
 0x5ab   :  { %v3434_v29 = vmul.f32 0.5, %v3969_v16 }
 0x5ac   :  { %4636 = vtanh.f32 %v3433_v51 }
 0x5ad   :  { %4638 = vtanh.f32 %v3434_v29 }
 0x5b6   :  { %v4637_v20 = vpop.eup %4636 }
 0x5b7   :  { %v4639_v21 = vpop.eup %4638  ;;  %v3445_v22 = vmul.f32 0.5, %v4637_v20 }
 0x5b8   :  { %v3446_v23 = vmul.f32 0.5, %v4639_v21 }
 0x5b9   :  { %v3451_v6 = vadd.f32 0.5, %v3445_v22 }
 0x5ba   :  { %v3452_v44 = vadd.f32 0.5, %v3446_v23 }
 0x5bb   :  { %3457 = vst [vmem:[#allocation10 + $0x20] sm:$0xff] %v3451_v6 }
 0x5bc   :  { %3458 = vst [vmem:[#allocation10 + $0x28] sm:$0xff] %v3452_v44 }
 0x5bd   :  { %4761 = shalt.err (!%p4758_p2)
}
 0x5be   :  { %s4762_s3 = scalar_lea.hbm %s5056_s10, 768 }
 0x5bf   :  { %p4763_p3 = scmp.ne.s32.totalorder %s5056_s10, %s4762_s3  ;;  %p4766_p4 = scmp.lt.u32.totalorder %s4762_s3, %s5056_s10 }
 0x5c1   :  { %p4768_p5 = pnand %p4766_p4, %p4763_p3 }
 0x5c3   :  { %4771 = shalt.err (!%p4768_p5)
}
 0x5c4   :  { %3468 = dma.vmem_to_hbm [thread:$0]  %s3466_s27, 768, %s5056_s10, [#allocation4]  }
 0x5c5   :  { %4778 = dma.done.wait [#allocation4], 768  }
 0x5c6   :  { %4779 = vsyncadd [#allocation4], 4294966528 }
 0x5c7   :  { %4780 = dma.done.wait [#allocation12], 128  }
 0x5c8   :  { %4781 = vsyncadd [#allocation12], 4294967168 }
 0x5c9   :  { %3485 = vsyncpa [#allocation3], 1 }
 0x5ca   :  { %3486 = vsyncpa [#allocation6], 1 }
 0x5cb   :  { %3487 = vsyncpa [#allocation9], 1 }
 0x5cc   :  { %3488 = vsyncpa [#allocation4], 1 }
 0x5cd   :  { %3489 = vsyncpa [#allocation12], 1 }

</bundles_post_ra>
